<compile_context>
chip_gen: v7x
topology: tpu7x:2x2x1
jax: 0.10.0
libtpu: 0.0.40
codegen_flags: <defaults>
</compile_context>

<pallas_src>
import math
import functools

import jax
import jax.numpy as jnp
from jax.experimental import pallas as pl
from jax.experimental.pallas import tpu as pltpu

NEG_INF = -1e9  # additive key-padding mask value (finite to avoid NaN corner cases)


def _layer_norm(x, g, b, eps=1e-5):
    mu = jnp.mean(x, axis=-1, keepdims=True)
    var = jnp.mean(jnp.square(x - mu), axis=-1, keepdims=True)
    return (x - mu) * jax.lax.rsqrt(var + eps) * g + b


def fused_transformer_kernel(x_ref, mask_ref,
                             wq_ref, bq_ref, wk_ref, bk_ref, wv_ref, bv_ref,
                             wo_ref, bo_ref, g1_ref, beta1_ref,
                             w1_ref, b1_ref, w2_ref, b2_ref, g2_ref, beta2_ref,
                             dec_w_ref, dec_b_ref,
                             out_ref, xs_ref, *, nhead):
    layer = pl.program_id(0)
    nlayers = pl.num_programs(0)

    B, S, D = xs_ref.shape
    hd = D // nhead
    scale = 1.0 / math.sqrt(hd)

    # Load the input activation into the resident VMEM scratch once.
    @pl.when(layer == 0)
    def _():
        xs_ref[...] = x_ref[...]

    x = xs_ref[...]                         # (B, S, D)
    xf = x.reshape(B * S, D)                # leading-dim reshape, lane dim preserved (free)
    madd = mask_ref[...]                    # (B, 1, S) additive key-padding mask

    wq = wq_ref[0]; bq = bq_ref[0]          # (H, D, hd), (H, 1, hd)
    wk = wk_ref[0]; bk = bk_ref[0]
    wv = wv_ref[0]; bv = bv_ref[0]
    wo = wo_ref[0]                          # (H, hd, D)

    # ---- multi-head self attention (head split via weight layout; no lane slicing) ----
    attn = jnp.zeros((B * S, D), jnp.float32)
    for h in range(nhead):                  # small static unroll; each iter is relayout-free
        qh = (jnp.dot(xf, wq[h], preferred_element_type=jnp.float32) + bq[h]) * scale
        kh = jnp.dot(xf, wk[h], preferred_element_type=jnp.float32) + bk[h]
        vh = jnp.dot(xf, wv[h], preferred_element_type=jnp.float32) + bv[h]
        qb = qh.reshape(B, S, hd)
        kb = kh.reshape(B, S, hd)
        vb = vh.reshape(B, S, hd)
        sc = jnp.einsum('bqd,bkd->bqk', qb, kb,
                        preferred_element_type=jnp.float32) + madd
        sc = sc - jnp.max(sc, axis=-1, keepdims=True)
        p = jnp.exp(sc)
        p = p * pl.reciprocal(jnp.sum(p, axis=-1, keepdims=True), approx=True)
        oh = jnp.einsum('bqk,bkd->bqd', p, vb, preferred_element_type=jnp.float32)
        # accumulate through the per-head slice of the output projection (== concat @ Wo)
        attn = attn + jnp.dot(oh.reshape(B * S, hd), wo[h],
                              preferred_element_type=jnp.float32)
    attn = attn + bo_ref[0]

    # ---- residual + layernorm1 ----
    y = _layer_norm(xf + attn, g1_ref[0], beta1_ref[0])

    # ---- feed-forward (relu) ----
    h1 = jnp.maximum(
        jnp.dot(y, w1_ref[0], preferred_element_type=jnp.float32) + b1_ref[0], 0.0)
    h2 = jnp.dot(h1, w2_ref[0], preferred_element_type=jnp.float32) + b2_ref[0]

    # ---- residual + layernorm2 ----
    z = _layer_norm(y + h2, g2_ref[0], beta2_ref[0])
    xs_ref[...] = z.reshape(B, S, D)        # carry activation to next grid step (VMEM)

    # ---- epilogue: flatten + decoder linear + sigmoid, only at the last layer ----
    @pl.when(layer == nlayers - 1)
    def _():
        ntoken = out_ref.shape[1]
        zb = z.reshape(B, S, D)
        acc = jnp.zeros((B, ntoken), jnp.float32)
        for s in range(S):                  # flatten folded into per-position matmuls
            acc = acc + jnp.dot(zb[:, s, :], dec_w_ref[s],
                                preferred_element_type=jnp.float32)
        logits = acc + dec_b_ref[...]
        out_ref[...] = pl.reciprocal(1.0 + jnp.exp(-logits), approx=True)


def transformer_cf_forward(params, tokens, mask, nhead):
    # tokens: (S, B) int32 token ids; mask: (B, S) bool key_padding_mask (True = ignore).
    S, B = tokens.shape
    D = params["emb"].shape[1]
    L = params["wq"].shape[0]
    ntoken = params["dec_b"].shape[1]
    nhid = params["w1"].shape[2]
    hd = D // nhead

    # TODO(synk): embedding gather + (S,B,D)->(B,S,D) transpose kept as XLA glue
    # (data-dependent gather; no clean rectangular BlockSpec at this size).
    src = jnp.take(params["emb"], tokens, axis=0)               # (S, B, D)
    x = jnp.transpose(src, (1, 0, 2)).astype(jnp.float32)       # (B, S, D)
    mask_add = jnp.where(mask, NEG_INF, 0.0).astype(jnp.float32).reshape(B, 1, S)

    def resident(shape):                    # same block every step -> loaded once, stays in VMEM
        return pl.BlockSpec(shape, lambda l: (0,) * len(shape))

    def per_layer(shape):                   # select layer l's slice; auto-prefetched
        nd = len(shape)
        return pl.BlockSpec((1,) + shape, lambda l, _nd=nd: (l,) + (0,) * _nd)

    in_specs = [
        resident((B, S, D)),                # x (used only at layer 0)
        resident((B, 1, S)),                # additive key-padding mask
        per_layer((nhead, D, hd)),          # wq   (head-major)
        per_layer((nhead, 1, hd)),          # bq
        per_layer((nhead, D, hd)),          # wk
        per_layer((nhead, 1, hd)),          # bk
        per_layer((nhead, D, hd)),          # wv
        per_layer((nhead, 1, hd)),          # bv
        per_layer((nhead, hd, D)),          # wo   (head-major)
        per_layer((1, D)),                  # bo
        per_layer((1, D)),                  # norm1 gamma
        per_layer((1, D)),                  # norm1 beta
        per_layer((D, nhid)),               # linear1 w
        per_layer((1, nhid)),               # linear1 b
        per_layer((nhid, D)),               # linear2 w
        per_layer((1, D)),                  # linear2 b
        per_layer((1, D)),                  # norm2 gamma
        per_layer((1, D)),                  # norm2 beta
        resident((S, D, ntoken)),           # decoder weight, reshaped (S, D, ntoken)
        resident((1, ntoken)),              # decoder bias
    ]

    return pl.pallas_call(
        functools.partial(fused_transformer_kernel, nhead=nhead),
        out_shape=jax.ShapeDtypeStruct((B, ntoken), jnp.float32),
        grid=(L,),                          # sequential loop over layers on one TC
        in_specs=in_specs,
        out_specs=pl.BlockSpec((B, ntoken), lambda l: (0, 0)),
        scratch_shapes=[pltpu.VMEM((B, S, D), jnp.float32)],
        compiler_params=pltpu.CompilerParams(
            dimension_semantics=("arbitrary",),      # layer axis is a carried dependency
            vmem_limit_bytes=32 * 1024 * 1024),      # explicit budget (safe on v5e/v6e/v7x)
    )(x, mask_add,
      params["wq"], params["bq"], params["wk"], params["bk"],
      params["wv"], params["bv"], params["wo"], params["bo"],
      params["g1"], params["beta1"], params["w1"], params["b1"],
      params["w2"], params["b2"], params["g2"], params["beta2"],
      params["dec_w"], params["dec_b"])


def init_params(key, ntoken, ninp, nhead, nhid, nlayers, nseq):
    hd = ninp // nhead
    keys = iter(jax.random.split(key, 6 * nlayers + 2))
    initrange = 0.1

    def xavier(shape, k):
        bound = math.sqrt(6.0 / (shape[0] + shape[1]))
        return jax.random.uniform(k, shape, minval=-bound, maxval=bound, dtype=jnp.float32)

    params = {
        "emb": jax.random.uniform(next(keys), (ntoken, ninp),
                                  minval=-initrange, maxval=initrange, dtype=jnp.float32)
    }

    lists = {name: [] for name in
             ["wq", "bq", "wk", "bk", "wv", "bv", "wo", "bo",
              "g1", "beta1", "w1", "b1", "w2", "b2", "g2", "beta2"]}
    for _ in range(nlayers):
        wq_l = xavier((ninp, ninp), next(keys))       # (in, out) layout
        wk_l = xavier((ninp, ninp), next(keys))
        wv_l = xavier((ninp, ninp), next(keys))
        wo_l = xavier((ninp, ninp), next(keys))
        w1_l = xavier((ninp, nhid), next(keys))
        w2_l = xavier((nhid, ninp), next(keys))
        # head-major layouts for the kernel (head h <-> contiguous hd-slice, PyTorch order)
        lists["wq"].append(jnp.transpose(wq_l.reshape(ninp, nhead, hd), (1, 0, 2)))
        lists["wk"].append(jnp.transpose(wk_l.reshape(ninp, nhead, hd), (1, 0, 2)))
        lists["wv"].append(jnp.transpose(wv_l.reshape(ninp, nhead, hd), (1, 0, 2)))
        lists["wo"].append(wo_l.reshape(nhead, hd, ninp))
        lists["bq"].append(jnp.zeros((nhead, 1, hd), jnp.float32))
        lists["bk"].append(jnp.zeros((nhead, 1, hd), jnp.float32))
        lists["bv"].append(jnp.zeros((nhead, 1, hd), jnp.float32))
        lists["bo"].append(jnp.zeros((1, ninp), jnp.float32))
        lists["g1"].append(jnp.ones((1, ninp), jnp.float32))
        lists["beta1"].append(jnp.zeros((1, ninp), jnp.float32))
        lists["w1"].append(w1_l)
        lists["b1"].append(jnp.zeros((1, nhid), jnp.float32))
        lists["w2"].append(w2_l)
        lists["b2"].append(jnp.zeros((1, ninp), jnp.float32))
        lists["g2"].append(jnp.ones((1, ninp), jnp.float32))
        lists["beta2"].append(jnp.zeros((1, ninp), jnp.float32))

    for name, vals in lists.items():
        params[name] = jnp.stack(vals, axis=0)

    # decoder: row index of (nseq*ninp, ntoken) is s*ninp + d  ->  reshape to (S, D, ntoken)
    params["dec_w"] = jax.random.uniform(next(keys), (nseq * ninp, ntoken),
                                         minval=-initrange, maxval=initrange,
                                         dtype=jnp.float32).reshape(nseq, ninp, ntoken)
    params["dec_b"] = jnp.zeros((1, ntoken), jnp.float32)
    return params


if __name__ == "__main__":
    ntoken, ninp, nhead, nhid, nlayers, nseq = 16, 32, 4, 64, 2, 8
    batch = 2

    key = jax.random.PRNGKey(0)
    k_param, k_tok = jax.random.split(key)
    params = init_params(k_param, ntoken, ninp, nhead, nhid, nlayers, nseq)

    tokens = jax.random.randint(k_tok, (nseq, batch), 0, ntoken, dtype=jnp.int32)
    # pad the last two positions of every batch row (not all positions -> softmax stays finite)
    mask = jnp.zeros((batch, nseq), dtype=bool).at[:, -2:].set(True)

    out = transformer_cf_forward(params, tokens, mask, nhead)
    out = jax.block_until_ready(out)
    assert out.shape == (batch, ntoken)
    assert bool(jnp.all(jnp.isfinite(out)))
    print("KERNEL_OK")
</pallas_src>

<mosaic_0001>
module attributes {stable_mosaic.version = 11 : i64} {
  func.func @fused_transformer_kernel(%arg0: i32, %arg1: memref<2x8x32xf32, #tpu.memory_space<vmem>>, %arg2: memref<2x1x8xf32, #tpu.memory_space<vmem>>, %arg3: memref<1x4x32x8xf32, #tpu.memory_space<vmem>>, %arg4: memref<1x4x1x8xf32, #tpu.memory_space<vmem>>, %arg5: memref<1x4x32x8xf32, #tpu.memory_space<vmem>>, %arg6: memref<1x4x1x8xf32, #tpu.memory_space<vmem>>, %arg7: memref<1x4x32x8xf32, #tpu.memory_space<vmem>>, %arg8: memref<1x4x1x8xf32, #tpu.memory_space<vmem>>, %arg9: memref<1x4x8x32xf32, #tpu.memory_space<vmem>>, %arg10: memref<1x1x32xf32, #tpu.memory_space<vmem>>, %arg11: memref<1x1x32xf32, #tpu.memory_space<vmem>>, %arg12: memref<1x1x32xf32, #tpu.memory_space<vmem>>, %arg13: memref<1x32x64xf32, #tpu.memory_space<vmem>>, %arg14: memref<1x1x64xf32, #tpu.memory_space<vmem>>, %arg15: memref<1x64x32xf32, #tpu.memory_space<vmem>>, %arg16: memref<1x1x32xf32, #tpu.memory_space<vmem>>, %arg17: memref<1x1x32xf32, #tpu.memory_space<vmem>>, %arg18: memref<1x1x32xf32, #tpu.memory_space<vmem>>, %arg19: memref<8x32x16xf32, #tpu.memory_space<vmem>>, %arg20: memref<1x16xf32, #tpu.memory_space<vmem>>, %arg21: memref<2x16xf32, #tpu.memory_space<vmem>>, %arg22: memref<2x8x32xf32, #tpu.memory_space<vmem>>) attributes {dimension_semantics = [#tpu.dimension_semantics<arbitrary>], iteration_bounds = array<i64: 2>, scalar_prefetch = 0 : i64, scratch_operands = 1 : i64, tpu.core_type = #tpu.core_type<tc>, window_params = [{pipeline_mode = #tpu.pipeline_mode<synchronous>, transform_indices = @transform_0, window_bounds = array<i64: 2, 8, 32>}, {pipeline_mode = #tpu.pipeline_mode<synchronous>, transform_indices = @transform_1, window_bounds = array<i64: 2, 1, 8>}, {transform_indices = @transform_2, window_bounds = array<i64: 1, 4, 32, 8>}, {transform_indices = @transform_3, window_bounds = array<i64: 1, 4, 1, 8>}, {transform_indices = @transform_4, window_bounds = array<i64: 1, 4, 32, 8>}, {transform_indices = @transform_5, window_bounds = array<i64: 1, 4, 1, 8>}, {transform_indices = @transform_6, window_bounds = array<i64: 1, 4, 32, 8>}, {transform_indices = @transform_7, window_bounds = array<i64: 1, 4, 1, 8>}, {transform_indices = @transform_8, window_bounds = array<i64: 1, 4, 8, 32>}, {transform_indices = @transform_9, window_bounds = array<i64: 1, 1, 32>}, {transform_indices = @transform_10, window_bounds = array<i64: 1, 1, 32>}, {transform_indices = @transform_11, window_bounds = array<i64: 1, 1, 32>}, {transform_indices = @transform_12, window_bounds = array<i64: 1, 32, 64>}, {transform_indices = @transform_13, window_bounds = array<i64: 1, 1, 64>}, {transform_indices = @transform_14, window_bounds = array<i64: 1, 64, 32>}, {transform_indices = @transform_15, window_bounds = array<i64: 1, 1, 32>}, {transform_indices = @transform_16, window_bounds = array<i64: 1, 1, 32>}, {transform_indices = @transform_17, window_bounds = array<i64: 1, 1, 32>}, {pipeline_mode = #tpu.pipeline_mode<synchronous>, transform_indices = @transform_18, window_bounds = array<i64: 8, 32, 16>}, {pipeline_mode = #tpu.pipeline_mode<synchronous>, transform_indices = @transform_19, window_bounds = array<i64: 1, 16>}, {pipeline_mode = #tpu.pipeline_mode<synchronous>, transform_indices = @transform_20, window_bounds = array<i64: 2, 16>}]} {
    %c0_i32 = arith.constant 0 : i32
    %0 = arith.cmpi eq, %arg0, %c0_i32 : i32
    %1 = arith.extui %0 : i1 to i32
    %c0_i32_0 = arith.constant 0 : i32
    %2 = arith.cmpi ne, %1, %c0_i32_0 : i32
    scf.if %2 {
      %c0_114 = arith.constant 0 : index
      %c0_115 = arith.constant 0 : index
      %c0_116 = arith.constant 0 : index
      %280 = vector.load %arg1[%c0_114, %c0_115, %c0_116] : memref<2x8x32xf32, #tpu.memory_space<vmem>>, vector<2x8x32xf32>
      %c0_117 = arith.constant 0 : index
      %c0_118 = arith.constant 0 : index
      %c0_119 = arith.constant 0 : index
      %281 = vector.load %arg22[%c0_117, %c0_118, %c0_119] : memref<2x8x32xf32, #tpu.memory_space<vmem>>, vector<2x8x32xf32>
      tpu.vector_store %arg22[%c0_117, %c0_118, %c0_119], %280 {strides = array<i32>} : memref<2x8x32xf32, #tpu.memory_space<vmem>>, vector<2x8x32xf32>,
    } else {
    }
    %c0 = arith.constant 0 : index
    %c0_1 = arith.constant 0 : index
    %c0_2 = arith.constant 0 : index
    %3 = vector.load %arg22[%c0, %c0_1, %c0_2] : memref<2x8x32xf32, #tpu.memory_space<vmem>>, vector<2x8x32xf32>
    %4 = vector.shape_cast %3 : vector<2x8x32xf32> to vector<16x32xf32>
    %c0_3 = arith.constant 0 : index
    %c0_4 = arith.constant 0 : index
    %c0_5 = arith.constant 0 : index
    %5 = vector.load %arg2[%c0_3, %c0_4, %c0_5] : memref<2x1x8xf32, #tpu.memory_space<vmem>>, vector<2x1x8xf32>
    %c0_6 = arith.constant 0 : index
    %c0_7 = arith.constant 0 : index
    %c0_8 = arith.constant 0 : index
    %c0_9 = arith.constant 0 : index
    %6 = vector.load %arg3[%c0_6, %c0_7, %c0_8, %c0_9] : memref<1x4x32x8xf32, #tpu.memory_space<vmem>>, vector<1x4x32x8xf32>
    %7 = vector.shape_cast %6 : vector<1x4x32x8xf32> to vector<4x32x8xf32>
    %c0_10 = arith.constant 0 : index
    %c0_11 = arith.constant 0 : index
    %c0_12 = arith.constant 0 : index
    %c0_13 = arith.constant 0 : index
    %8 = vector.load %arg4[%c0_10, %c0_11, %c0_12, %c0_13] : memref<1x4x1x8xf32, #tpu.memory_space<vmem>>, vector<1x4x1x8xf32>
    %9 = vector.shape_cast %8 : vector<1x4x1x8xf32> to vector<4x1x8xf32>
    %c0_14 = arith.constant 0 : index
    %c0_15 = arith.constant 0 : index
    %c0_16 = arith.constant 0 : index
    %c0_17 = arith.constant 0 : index
    %10 = vector.load %arg5[%c0_14, %c0_15, %c0_16, %c0_17] : memref<1x4x32x8xf32, #tpu.memory_space<vmem>>, vector<1x4x32x8xf32>
    %11 = vector.shape_cast %10 : vector<1x4x32x8xf32> to vector<4x32x8xf32>
    %c0_18 = arith.constant 0 : index
    %c0_19 = arith.constant 0 : index
    %c0_20 = arith.constant 0 : index
    %c0_21 = arith.constant 0 : index
    %12 = vector.load %arg6[%c0_18, %c0_19, %c0_20, %c0_21] : memref<1x4x1x8xf32, #tpu.memory_space<vmem>>, vector<1x4x1x8xf32>
    %13 = vector.shape_cast %12 : vector<1x4x1x8xf32> to vector<4x1x8xf32>
    %c0_22 = arith.constant 0 : index
    %c0_23 = arith.constant 0 : index
    %c0_24 = arith.constant 0 : index
    %c0_25 = arith.constant 0 : index
    %14 = vector.load %arg7[%c0_22, %c0_23, %c0_24, %c0_25] : memref<1x4x32x8xf32, #tpu.memory_space<vmem>>, vector<1x4x32x8xf32>
    %15 = vector.shape_cast %14 : vector<1x4x32x8xf32> to vector<4x32x8xf32>
    %c0_26 = arith.constant 0 : index
    %c0_27 = arith.constant 0 : index
    %c0_28 = arith.constant 0 : index
    %c0_29 = arith.constant 0 : index
    %16 = vector.load %arg8[%c0_26, %c0_27, %c0_28, %c0_29] : memref<1x4x1x8xf32, #tpu.memory_space<vmem>>, vector<1x4x1x8xf32>
    %17 = vector.shape_cast %16 : vector<1x4x1x8xf32> to vector<4x1x8xf32>
    %c0_30 = arith.constant 0 : index
    %c0_31 = arith.constant 0 : index
    %c0_32 = arith.constant 0 : index
    %c0_33 = arith.constant 0 : index
    %18 = vector.load %arg9[%c0_30, %c0_31, %c0_32, %c0_33] : memref<1x4x8x32xf32, #tpu.memory_space<vmem>>, vector<1x4x8x32xf32>
    %19 = vector.shape_cast %18 : vector<1x4x8x32xf32> to vector<4x8x32xf32>
    %cst = arith.constant 0.000000e+00 : f32
    %20 = vector.broadcast %cst : f32 to vector<16x32xf32>
    %21 = vector.extract_strided_slice %7 {offsets = [0, 0, 0], sizes = [1, 32, 8], strides = [1, 1, 1]} : vector<4x32x8xf32> to vector<1x32x8xf32>
    %22 = vector.shape_cast %21 : vector<1x32x8xf32> to vector<32x8xf32>
    %cst_34 = arith.constant dense<0.000000e+00> : vector<16x8xf32>
    %23 = tpu.matmul %4, %22, %cst_34 {dimension_numbers = #tpu.dot_dimension_numbers<[1], [0], [0], [1], [0, 0, 1, 1], [], []>} : vector<16x32xf32>, vector<32x8xf32>, vector<16x8xf32> -> vector<16x8xf32>
    %24 = vector.extract_strided_slice %9 {offsets = [0, 0, 0], sizes = [1, 1, 8], strides = [1, 1, 1]} : vector<4x1x8xf32> to vector<1x1x8xf32>
    %25 = vector.shape_cast %24 : vector<1x1x8xf32> to vector<1x8xf32>
    %26 = vector.broadcast %25 : vector<1x8xf32> to vector<16x8xf32>
    %27 = arith.addf %23, %26 : vector<16x8xf32>
    %cst_35 = arith.constant 0.353553385 : f32
    %28 = vector.broadcast %cst_35 : f32 to vector<16x8xf32>
    %29 = arith.mulf %27, %28 : vector<16x8xf32>
    %30 = vector.extract_strided_slice %11 {offsets = [0, 0, 0], sizes = [1, 32, 8], strides = [1, 1, 1]} : vector<4x32x8xf32> to vector<1x32x8xf32>
    %31 = vector.shape_cast %30 : vector<1x32x8xf32> to vector<32x8xf32>
    %cst_36 = arith.constant dense<0.000000e+00> : vector<16x8xf32>
    %32 = tpu.matmul %4, %31, %cst_36 {dimension_numbers = #tpu.dot_dimension_numbers<[1], [0], [0], [1], [0, 0, 1, 1], [], []>} : vector<16x32xf32>, vector<32x8xf32>, vector<16x8xf32> -> vector<16x8xf32>
    %33 = vector.extract_strided_slice %13 {offsets = [0, 0, 0], sizes = [1, 1, 8], strides = [1, 1, 1]} : vector<4x1x8xf32> to vector<1x1x8xf32>
    %34 = vector.shape_cast %33 : vector<1x1x8xf32> to vector<1x8xf32>
    %35 = vector.broadcast %34 : vector<1x8xf32> to vector<16x8xf32>
    %36 = arith.addf %32, %35 : vector<16x8xf32>
    %37 = vector.extract_strided_slice %15 {offsets = [0, 0, 0], sizes = [1, 32, 8], strides = [1, 1, 1]} : vector<4x32x8xf32> to vector<1x32x8xf32>
    %38 = vector.shape_cast %37 : vector<1x32x8xf32> to vector<32x8xf32>
    %cst_37 = arith.constant dense<0.000000e+00> : vector<16x8xf32>
    %39 = tpu.matmul %4, %38, %cst_37 {dimension_numbers = #tpu.dot_dimension_numbers<[1], [0], [0], [1], [0, 0, 1, 1], [], []>} : vector<16x32xf32>, vector<32x8xf32>, vector<16x8xf32> -> vector<16x8xf32>
    %40 = vector.extract_strided_slice %17 {offsets = [0, 0, 0], sizes = [1, 1, 8], strides = [1, 1, 1]} : vector<4x1x8xf32> to vector<1x1x8xf32>
    %41 = vector.shape_cast %40 : vector<1x1x8xf32> to vector<1x8xf32>
    %42 = vector.broadcast %41 : vector<1x8xf32> to vector<16x8xf32>
    %43 = arith.addf %39, %42 : vector<16x8xf32>
    %44 = vector.shape_cast %29 : vector<16x8xf32> to vector<2x8x8xf32>
    %45 = vector.shape_cast %36 : vector<16x8xf32> to vector<2x8x8xf32>
    %46 = vector.shape_cast %43 : vector<16x8xf32> to vector<2x8x8xf32>
    "tpu.trace_start"() <{level = 10 : i32, message = "bqd,bkd->bqk"}> : () -> ()
    %cst_38 = arith.constant dense<0.000000e+00> : vector<2x8x8xf32>
    %47 = tpu.matmul %44, %45, %cst_38 {dimension_numbers = #tpu.dot_dimension_numbers<[2], [2], [1], [1], [0, 0, 0, 1, 1, 1], [0], [0]>} : vector<2x8x8xf32>, vector<2x8x8xf32>, vector<2x8x8xf32> -> vector<2x8x8xf32>
    "tpu.trace_stop"() : () -> ()
    %48 = vector.broadcast %5 : vector<2x1x8xf32> to vector<2x8x8xf32>
    %49 = arith.addf %47, %48 : vector<2x8x8xf32>
    %cst_39 = arith.constant dense<0xFF800000> : vector<2x8xf32>
    %50 = vector.multi_reduction <maximumf>, %49, %cst_39 [2] : vector<2x8x8xf32> to vector<2x8xf32>
    %51 = vector.shape_cast %50 : vector<2x8xf32> to vector<2x8x1xf32>
    %52 = vector.broadcast %51 : vector<2x8x1xf32> to vector<2x8x8xf32>
    %53 = arith.subf %49, %52 : vector<2x8x8xf32>
    %54 = math.exp %53 : vector<2x8x8xf32>
    %cst_40 = arith.constant dense<0.000000e+00> : vector<2x8xf32>
    %55 = vector.multi_reduction <add>, %54, %cst_40 [2] : vector<2x8x8xf32> to vector<2x8xf32>
    %56 = vector.shape_cast %55 : vector<2x8xf32> to vector<2x8x1xf32>
    %57 = tpu.reciprocal %56 {approx = true} : vector<2x8x1xf32> -> vector<2x8x1xf32>
    %58 = vector.broadcast %57 : vector<2x8x1xf32> to vector<2x8x8xf32>
    %59 = arith.mulf %54, %58 : vector<2x8x8xf32>
    "tpu.trace_start"() <{level = 10 : i32, message = "bqk,bkd->bqd"}> : () -> ()
    %cst_41 = arith.constant dense<0.000000e+00> : vector<2x8x8xf32>
    %60 = tpu.matmul %59, %46, %cst_41 {dimension_numbers = #tpu.dot_dimension_numbers<[2], [1], [1], [2], [0, 0, 0, 1, 1, 2], [0], [0]>} : vector<2x8x8xf32>, vector<2x8x8xf32>, vector<2x8x8xf32> -> vector<2x8x8xf32>
    "tpu.trace_stop"() : () -> ()
    %61 = vector.shape_cast %60 : vector<2x8x8xf32> to vector<16x8xf32>
    %62 = vector.extract_strided_slice %19 {offsets = [0, 0, 0], sizes = [1, 8, 32], strides = [1, 1, 1]} : vector<4x8x32xf32> to vector<1x8x32xf32>
    %63 = vector.shape_cast %62 : vector<1x8x32xf32> to vector<8x32xf32>
    %cst_42 = arith.constant dense<0.000000e+00> : vector<16x32xf32>
    %64 = tpu.matmul %61, %63, %cst_42 {dimension_numbers = #tpu.dot_dimension_numbers<[1], [0], [0], [1], [0, 0, 1, 1], [], []>} : vector<16x8xf32>, vector<8x32xf32>, vector<16x32xf32> -> vector<16x32xf32>
    %65 = arith.addf %20, %64 : vector<16x32xf32>
    %66 = vector.extract_strided_slice %7 {offsets = [1, 0, 0], sizes = [1, 32, 8], strides = [1, 1, 1]} : vector<4x32x8xf32> to vector<1x32x8xf32>
    %67 = vector.shape_cast %66 : vector<1x32x8xf32> to vector<32x8xf32>
    %cst_43 = arith.constant dense<0.000000e+00> : vector<16x8xf32>
    %68 = tpu.matmul %4, %67, %cst_43 {dimension_numbers = #tpu.dot_dimension_numbers<[1], [0], [0], [1], [0, 0, 1, 1], [], []>} : vector<16x32xf32>, vector<32x8xf32>, vector<16x8xf32> -> vector<16x8xf32>
    %69 = vector.extract_strided_slice %9 {offsets = [1, 0, 0], sizes = [1, 1, 8], strides = [1, 1, 1]} : vector<4x1x8xf32> to vector<1x1x8xf32>
    %70 = vector.shape_cast %69 : vector<1x1x8xf32> to vector<1x8xf32>
    %71 = vector.broadcast %70 : vector<1x8xf32> to vector<16x8xf32>
    %72 = arith.addf %68, %71 : vector<16x8xf32>
    %cst_44 = arith.constant 0.353553385 : f32
    %73 = vector.broadcast %cst_44 : f32 to vector<16x8xf32>
    %74 = arith.mulf %72, %73 : vector<16x8xf32>
    %75 = vector.extract_strided_slice %11 {offsets = [1, 0, 0], sizes = [1, 32, 8], strides = [1, 1, 1]} : vector<4x32x8xf32> to vector<1x32x8xf32>
    %76 = vector.shape_cast %75 : vector<1x32x8xf32> to vector<32x8xf32>
    %cst_45 = arith.constant dense<0.000000e+00> : vector<16x8xf32>
    %77 = tpu.matmul %4, %76, %cst_45 {dimension_numbers = #tpu.dot_dimension_numbers<[1], [0], [0], [1], [0, 0, 1, 1], [], []>} : vector<16x32xf32>, vector<32x8xf32>, vector<16x8xf32> -> vector<16x8xf32>
    %78 = vector.extract_strided_slice %13 {offsets = [1, 0, 0], sizes = [1, 1, 8], strides = [1, 1, 1]} : vector<4x1x8xf32> to vector<1x1x8xf32>
    %79 = vector.shape_cast %78 : vector<1x1x8xf32> to vector<1x8xf32>
    %80 = vector.broadcast %79 : vector<1x8xf32> to vector<16x8xf32>
    %81 = arith.addf %77, %80 : vector<16x8xf32>
    %82 = vector.extract_strided_slice %15 {offsets = [1, 0, 0], sizes = [1, 32, 8], strides = [1, 1, 1]} : vector<4x32x8xf32> to vector<1x32x8xf32>
    %83 = vector.shape_cast %82 : vector<1x32x8xf32> to vector<32x8xf32>
    %cst_46 = arith.constant dense<0.000000e+00> : vector<16x8xf32>
    %84 = tpu.matmul %4, %83, %cst_46 {dimension_numbers = #tpu.dot_dimension_numbers<[1], [0], [0], [1], [0, 0, 1, 1], [], []>} : vector<16x32xf32>, vector<32x8xf32>, vector<16x8xf32> -> vector<16x8xf32>
    %85 = vector.extract_strided_slice %17 {offsets = [1, 0, 0], sizes = [1, 1, 8], strides = [1, 1, 1]} : vector<4x1x8xf32> to vector<1x1x8xf32>
    %86 = vector.shape_cast %85 : vector<1x1x8xf32> to vector<1x8xf32>
    %87 = vector.broadcast %86 : vector<1x8xf32> to vector<16x8xf32>
    %88 = arith.addf %84, %87 : vector<16x8xf32>
    %89 = vector.shape_cast %74 : vector<16x8xf32> to vector<2x8x8xf32>
    %90 = vector.shape_cast %81 : vector<16x8xf32> to vector<2x8x8xf32>
    %91 = vector.shape_cast %88 : vector<16x8xf32> to vector<2x8x8xf32>
    "tpu.trace_start"() <{level = 10 : i32, message = "bqd,bkd->bqk"}> : () -> ()
    %cst_47 = arith.constant dense<0.000000e+00> : vector<2x8x8xf32>
    %92 = tpu.matmul %89, %90, %cst_47 {dimension_numbers = #tpu.dot_dimension_numbers<[2], [2], [1], [1], [0, 0, 0, 1, 1, 1], [0], [0]>} : vector<2x8x8xf32>, vector<2x8x8xf32>, vector<2x8x8xf32> -> vector<2x8x8xf32>
    "tpu.trace_stop"() : () -> ()
    %93 = vector.broadcast %5 : vector<2x1x8xf32> to vector<2x8x8xf32>
    %94 = arith.addf %92, %93 : vector<2x8x8xf32>
    %cst_48 = arith.constant dense<0xFF800000> : vector<2x8xf32>
    %95 = vector.multi_reduction <maximumf>, %94, %cst_48 [2] : vector<2x8x8xf32> to vector<2x8xf32>
    %96 = vector.shape_cast %95 : vector<2x8xf32> to vector<2x8x1xf32>
    %97 = vector.broadcast %96 : vector<2x8x1xf32> to vector<2x8x8xf32>
    %98 = arith.subf %94, %97 : vector<2x8x8xf32>
    %99 = math.exp %98 : vector<2x8x8xf32>
    %cst_49 = arith.constant dense<0.000000e+00> : vector<2x8xf32>
    %100 = vector.multi_reduction <add>, %99, %cst_49 [2] : vector<2x8x8xf32> to vector<2x8xf32>
    %101 = vector.shape_cast %100 : vector<2x8xf32> to vector<2x8x1xf32>
    %102 = tpu.reciprocal %101 {approx = true} : vector<2x8x1xf32> -> vector<2x8x1xf32>
    %103 = vector.broadcast %102 : vector<2x8x1xf32> to vector<2x8x8xf32>
    %104 = arith.mulf %99, %103 : vector<2x8x8xf32>
    "tpu.trace_start"() <{level = 10 : i32, message = "bqk,bkd->bqd"}> : () -> ()
    %cst_50 = arith.constant dense<0.000000e+00> : vector<2x8x8xf32>
    %105 = tpu.matmul %104, %91, %cst_50 {dimension_numbers = #tpu.dot_dimension_numbers<[2], [1], [1], [2], [0, 0, 0, 1, 1, 2], [0], [0]>} : vector<2x8x8xf32>, vector<2x8x8xf32>, vector<2x8x8xf32> -> vector<2x8x8xf32>
    "tpu.trace_stop"() : () -> ()
    %106 = vector.shape_cast %105 : vector<2x8x8xf32> to vector<16x8xf32>
    %107 = vector.extract_strided_slice %19 {offsets = [1, 0, 0], sizes = [1, 8, 32], strides = [1, 1, 1]} : vector<4x8x32xf32> to vector<1x8x32xf32>
    %108 = vector.shape_cast %107 : vector<1x8x32xf32> to vector<8x32xf32>
    %cst_51 = arith.constant dense<0.000000e+00> : vector<16x32xf32>
    %109 = tpu.matmul %106, %108, %cst_51 {dimension_numbers = #tpu.dot_dimension_numbers<[1], [0], [0], [1], [0, 0, 1, 1], [], []>} : vector<16x8xf32>, vector<8x32xf32>, vector<16x32xf32> -> vector<16x32xf32>
    %110 = arith.addf %65, %109 : vector<16x32xf32>
    %111 = vector.extract_strided_slice %7 {offsets = [2, 0, 0], sizes = [1, 32, 8], strides = [1, 1, 1]} : vector<4x32x8xf32> to vector<1x32x8xf32>
    %112 = vector.shape_cast %111 : vector<1x32x8xf32> to vector<32x8xf32>
    %cst_52 = arith.constant dense<0.000000e+00> : vector<16x8xf32>
    %113 = tpu.matmul %4, %112, %cst_52 {dimension_numbers = #tpu.dot_dimension_numbers<[1], [0], [0], [1], [0, 0, 1, 1], [], []>} : vector<16x32xf32>, vector<32x8xf32>, vector<16x8xf32> -> vector<16x8xf32>
    %114 = vector.extract_strided_slice %9 {offsets = [2, 0, 0], sizes = [1, 1, 8], strides = [1, 1, 1]} : vector<4x1x8xf32> to vector<1x1x8xf32>
    %115 = vector.shape_cast %114 : vector<1x1x8xf32> to vector<1x8xf32>
    %116 = vector.broadcast %115 : vector<1x8xf32> to vector<16x8xf32>
    %117 = arith.addf %113, %116 : vector<16x8xf32>
    %cst_53 = arith.constant 0.353553385 : f32
    %118 = vector.broadcast %cst_53 : f32 to vector<16x8xf32>
    %119 = arith.mulf %117, %118 : vector<16x8xf32>
    %120 = vector.extract_strided_slice %11 {offsets = [2, 0, 0], sizes = [1, 32, 8], strides = [1, 1, 1]} : vector<4x32x8xf32> to vector<1x32x8xf32>
    %121 = vector.shape_cast %120 : vector<1x32x8xf32> to vector<32x8xf32>
    %cst_54 = arith.constant dense<0.000000e+00> : vector<16x8xf32>
    %122 = tpu.matmul %4, %121, %cst_54 {dimension_numbers = #tpu.dot_dimension_numbers<[1], [0], [0], [1], [0, 0, 1, 1], [], []>} : vector<16x32xf32>, vector<32x8xf32>, vector<16x8xf32> -> vector<16x8xf32>
    %123 = vector.extract_strided_slice %13 {offsets = [2, 0, 0], sizes = [1, 1, 8], strides = [1, 1, 1]} : vector<4x1x8xf32> to vector<1x1x8xf32>
    %124 = vector.shape_cast %123 : vector<1x1x8xf32> to vector<1x8xf32>
    %125 = vector.broadcast %124 : vector<1x8xf32> to vector<16x8xf32>
    %126 = arith.addf %122, %125 : vector<16x8xf32>
    %127 = vector.extract_strided_slice %15 {offsets = [2, 0, 0], sizes = [1, 32, 8], strides = [1, 1, 1]} : vector<4x32x8xf32> to vector<1x32x8xf32>
    %128 = vector.shape_cast %127 : vector<1x32x8xf32> to vector<32x8xf32>
    %cst_55 = arith.constant dense<0.000000e+00> : vector<16x8xf32>
    %129 = tpu.matmul %4, %128, %cst_55 {dimension_numbers = #tpu.dot_dimension_numbers<[1], [0], [0], [1], [0, 0, 1, 1], [], []>} : vector<16x32xf32>, vector<32x8xf32>, vector<16x8xf32> -> vector<16x8xf32>
    %130 = vector.extract_strided_slice %17 {offsets = [2, 0, 0], sizes = [1, 1, 8], strides = [1, 1, 1]} : vector<4x1x8xf32> to vector<1x1x8xf32>
    %131 = vector.shape_cast %130 : vector<1x1x8xf32> to vector<1x8xf32>
    %132 = vector.broadcast %131 : vector<1x8xf32> to vector<16x8xf32>
    %133 = arith.addf %129, %132 : vector<16x8xf32>
    %134 = vector.shape_cast %119 : vector<16x8xf32> to vector<2x8x8xf32>
    %135 = vector.shape_cast %126 : vector<16x8xf32> to vector<2x8x8xf32>
    %136 = vector.shape_cast %133 : vector<16x8xf32> to vector<2x8x8xf32>
    "tpu.trace_start"() <{level = 10 : i32, message = "bqd,bkd->bqk"}> : () -> ()
    %cst_56 = arith.constant dense<0.000000e+00> : vector<2x8x8xf32>
    %137 = tpu.matmul %134, %135, %cst_56 {dimension_numbers = #tpu.dot_dimension_numbers<[2], [2], [1], [1], [0, 0, 0, 1, 1, 1], [0], [0]>} : vector<2x8x8xf32>, vector<2x8x8xf32>, vector<2x8x8xf32> -> vector<2x8x8xf32>
    "tpu.trace_stop"() : () -> ()
    %138 = vector.broadcast %5 : vector<2x1x8xf32> to vector<2x8x8xf32>
    %139 = arith.addf %137, %138 : vector<2x8x8xf32>
    %cst_57 = arith.constant dense<0xFF800000> : vector<2x8xf32>
    %140 = vector.multi_reduction <maximumf>, %139, %cst_57 [2] : vector<2x8x8xf32> to vector<2x8xf32>
    %141 = vector.shape_cast %140 : vector<2x8xf32> to vector<2x8x1xf32>
    %142 = vector.broadcast %141 : vector<2x8x1xf32> to vector<2x8x8xf32>
    %143 = arith.subf %139, %142 : vector<2x8x8xf32>
    %144 = math.exp %143 : vector<2x8x8xf32>
    %cst_58 = arith.constant dense<0.000000e+00> : vector<2x8xf32>
    %145 = vector.multi_reduction <add>, %144, %cst_58 [2] : vector<2x8x8xf32> to vector<2x8xf32>
    %146 = vector.shape_cast %145 : vector<2x8xf32> to vector<2x8x1xf32>
    %147 = tpu.reciprocal %146 {approx = true} : vector<2x8x1xf32> -> vector<2x8x1xf32>
    %148 = vector.broadcast %147 : vector<2x8x1xf32> to vector<2x8x8xf32>
    %149 = arith.mulf %144, %148 : vector<2x8x8xf32>
    "tpu.trace_start"() <{level = 10 : i32, message = "bqk,bkd->bqd"}> : () -> ()
    %cst_59 = arith.constant dense<0.000000e+00> : vector<2x8x8xf32>
    %150 = tpu.matmul %149, %136, %cst_59 {dimension_numbers = #tpu.dot_dimension_numbers<[2], [1], [1], [2], [0, 0, 0, 1, 1, 2], [0], [0]>} : vector<2x8x8xf32>, vector<2x8x8xf32>, vector<2x8x8xf32> -> vector<2x8x8xf32>
    "tpu.trace_stop"() : () -> ()
    %151 = vector.shape_cast %150 : vector<2x8x8xf32> to vector<16x8xf32>
    %152 = vector.extract_strided_slice %19 {offsets = [2, 0, 0], sizes = [1, 8, 32], strides = [1, 1, 1]} : vector<4x8x32xf32> to vector<1x8x32xf32>
    %153 = vector.shape_cast %152 : vector<1x8x32xf32> to vector<8x32xf32>
    %cst_60 = arith.constant dense<0.000000e+00> : vector<16x32xf32>
    %154 = tpu.matmul %151, %153, %cst_60 {dimension_numbers = #tpu.dot_dimension_numbers<[1], [0], [0], [1], [0, 0, 1, 1], [], []>} : vector<16x8xf32>, vector<8x32xf32>, vector<16x32xf32> -> vector<16x32xf32>
    %155 = arith.addf %110, %154 : vector<16x32xf32>
    %156 = vector.extract_strided_slice %7 {offsets = [3, 0, 0], sizes = [1, 32, 8], strides = [1, 1, 1]} : vector<4x32x8xf32> to vector<1x32x8xf32>
    %157 = vector.shape_cast %156 : vector<1x32x8xf32> to vector<32x8xf32>
    %cst_61 = arith.constant dense<0.000000e+00> : vector<16x8xf32>
    %158 = tpu.matmul %4, %157, %cst_61 {dimension_numbers = #tpu.dot_dimension_numbers<[1], [0], [0], [1], [0, 0, 1, 1], [], []>} : vector<16x32xf32>, vector<32x8xf32>, vector<16x8xf32> -> vector<16x8xf32>
    %159 = vector.extract_strided_slice %9 {offsets = [3, 0, 0], sizes = [1, 1, 8], strides = [1, 1, 1]} : vector<4x1x8xf32> to vector<1x1x8xf32>
    %160 = vector.shape_cast %159 : vector<1x1x8xf32> to vector<1x8xf32>
    %161 = vector.broadcast %160 : vector<1x8xf32> to vector<16x8xf32>
    %162 = arith.addf %158, %161 : vector<16x8xf32>
    %cst_62 = arith.constant 0.353553385 : f32
    %163 = vector.broadcast %cst_62 : f32 to vector<16x8xf32>
    %164 = arith.mulf %162, %163 : vector<16x8xf32>
    %165 = vector.extract_strided_slice %11 {offsets = [3, 0, 0], sizes = [1, 32, 8], strides = [1, 1, 1]} : vector<4x32x8xf32> to vector<1x32x8xf32>
    %166 = vector.shape_cast %165 : vector<1x32x8xf32> to vector<32x8xf32>
    %cst_63 = arith.constant dense<0.000000e+00> : vector<16x8xf32>
    %167 = tpu.matmul %4, %166, %cst_63 {dimension_numbers = #tpu.dot_dimension_numbers<[1], [0], [0], [1], [0, 0, 1, 1], [], []>} : vector<16x32xf32>, vector<32x8xf32>, vector<16x8xf32> -> vector<16x8xf32>
    %168 = vector.extract_strided_slice %13 {offsets = [3, 0, 0], sizes = [1, 1, 8], strides = [1, 1, 1]} : vector<4x1x8xf32> to vector<1x1x8xf32>
    %169 = vector.shape_cast %168 : vector<1x1x8xf32> to vector<1x8xf32>
    %170 = vector.broadcast %169 : vector<1x8xf32> to vector<16x8xf32>
    %171 = arith.addf %167, %170 : vector<16x8xf32>
    %172 = vector.extract_strided_slice %15 {offsets = [3, 0, 0], sizes = [1, 32, 8], strides = [1, 1, 1]} : vector<4x32x8xf32> to vector<1x32x8xf32>
    %173 = vector.shape_cast %172 : vector<1x32x8xf32> to vector<32x8xf32>
    %cst_64 = arith.constant dense<0.000000e+00> : vector<16x8xf32>
    %174 = tpu.matmul %4, %173, %cst_64 {dimension_numbers = #tpu.dot_dimension_numbers<[1], [0], [0], [1], [0, 0, 1, 1], [], []>} : vector<16x32xf32>, vector<32x8xf32>, vector<16x8xf32> -> vector<16x8xf32>
    %175 = vector.extract_strided_slice %17 {offsets = [3, 0, 0], sizes = [1, 1, 8], strides = [1, 1, 1]} : vector<4x1x8xf32> to vector<1x1x8xf32>
    %176 = vector.shape_cast %175 : vector<1x1x8xf32> to vector<1x8xf32>
    %177 = vector.broadcast %176 : vector<1x8xf32> to vector<16x8xf32>
    %178 = arith.addf %174, %177 : vector<16x8xf32>
    %179 = vector.shape_cast %164 : vector<16x8xf32> to vector<2x8x8xf32>
    %180 = vector.shape_cast %171 : vector<16x8xf32> to vector<2x8x8xf32>
    %181 = vector.shape_cast %178 : vector<16x8xf32> to vector<2x8x8xf32>
    "tpu.trace_start"() <{level = 10 : i32, message = "bqd,bkd->bqk"}> : () -> ()
    %cst_65 = arith.constant dense<0.000000e+00> : vector<2x8x8xf32>
    %182 = tpu.matmul %179, %180, %cst_65 {dimension_numbers = #tpu.dot_dimension_numbers<[2], [2], [1], [1], [0, 0, 0, 1, 1, 1], [0], [0]>} : vector<2x8x8xf32>, vector<2x8x8xf32>, vector<2x8x8xf32> -> vector<2x8x8xf32>
    "tpu.trace_stop"() : () -> ()
    %183 = vector.broadcast %5 : vector<2x1x8xf32> to vector<2x8x8xf32>
    %184 = arith.addf %182, %183 : vector<2x8x8xf32>
    %cst_66 = arith.constant dense<0xFF800000> : vector<2x8xf32>
    %185 = vector.multi_reduction <maximumf>, %184, %cst_66 [2] : vector<2x8x8xf32> to vector<2x8xf32>
    %186 = vector.shape_cast %185 : vector<2x8xf32> to vector<2x8x1xf32>
    %187 = vector.broadcast %186 : vector<2x8x1xf32> to vector<2x8x8xf32>
    %188 = arith.subf %184, %187 : vector<2x8x8xf32>
    %189 = math.exp %188 : vector<2x8x8xf32>
    %cst_67 = arith.constant dense<0.000000e+00> : vector<2x8xf32>
    %190 = vector.multi_reduction <add>, %189, %cst_67 [2] : vector<2x8x8xf32> to vector<2x8xf32>
    %191 = vector.shape_cast %190 : vector<2x8xf32> to vector<2x8x1xf32>
    %192 = tpu.reciprocal %191 {approx = true} : vector<2x8x1xf32> -> vector<2x8x1xf32>
    %193 = vector.broadcast %192 : vector<2x8x1xf32> to vector<2x8x8xf32>
    %194 = arith.mulf %189, %193 : vector<2x8x8xf32>
    "tpu.trace_start"() <{level = 10 : i32, message = "bqk,bkd->bqd"}> : () -> ()
    %cst_68 = arith.constant dense<0.000000e+00> : vector<2x8x8xf32>
    %195 = tpu.matmul %194, %181, %cst_68 {dimension_numbers = #tpu.dot_dimension_numbers<[2], [1], [1], [2], [0, 0, 0, 1, 1, 2], [0], [0]>} : vector<2x8x8xf32>, vector<2x8x8xf32>, vector<2x8x8xf32> -> vector<2x8x8xf32>
    "tpu.trace_stop"() : () -> ()
    %196 = vector.shape_cast %195 : vector<2x8x8xf32> to vector<16x8xf32>
    %197 = vector.extract_strided_slice %19 {offsets = [3, 0, 0], sizes = [1, 8, 32], strides = [1, 1, 1]} : vector<4x8x32xf32> to vector<1x8x32xf32>
    %198 = vector.shape_cast %197 : vector<1x8x32xf32> to vector<8x32xf32>
    %cst_69 = arith.constant dense<0.000000e+00> : vector<16x32xf32>
    %199 = tpu.matmul %196, %198, %cst_69 {dimension_numbers = #tpu.dot_dimension_numbers<[1], [0], [0], [1], [0, 0, 1, 1], [], []>} : vector<16x8xf32>, vector<8x32xf32>, vector<16x32xf32> -> vector<16x32xf32>
    %200 = arith.addf %155, %199 : vector<16x32xf32>
    %c0_70 = arith.constant 0 : index
    %c0_71 = arith.constant 0 : index
    %c0_72 = arith.constant 0 : index
    %201 = vector.load %arg10[%c0_70, %c0_71, %c0_72] : memref<1x1x32xf32, #tpu.memory_space<vmem>>, vector<1x1x32xf32>
    %202 = vector.shape_cast %201 : vector<1x1x32xf32> to vector<1x32xf32>
    %203 = vector.broadcast %202 : vector<1x32xf32> to vector<16x32xf32>
    %204 = arith.addf %200, %203 : vector<16x32xf32>
    %205 = arith.addf %4, %204 : vector<16x32xf32>
    %c0_73 = arith.constant 0 : index
    %c0_74 = arith.constant 0 : index
    %c0_75 = arith.constant 0 : index
    %206 = vector.load %arg11[%c0_73, %c0_74, %c0_75] : memref<1x1x32xf32, #tpu.memory_space<vmem>>, vector<1x1x32xf32>
    %207 = vector.shape_cast %206 : vector<1x1x32xf32> to vector<1x32xf32>
    %c0_76 = arith.constant 0 : index
    %c0_77 = arith.constant 0 : index
    %c0_78 = arith.constant 0 : index
    %208 = vector.load %arg12[%c0_76, %c0_77, %c0_78] : memref<1x1x32xf32, #tpu.memory_space<vmem>>, vector<1x1x32xf32>
    %209 = vector.shape_cast %208 : vector<1x1x32xf32> to vector<1x32xf32>
    %cst_79 = arith.constant dense<0.000000e+00> : vector<16xf32>
    %210 = vector.multi_reduction <add>, %205, %cst_79 [1] : vector<16x32xf32> to vector<16xf32>
    %211 = vector.shape_cast %210 : vector<16xf32> to vector<16x1xf32>
    %cst_80 = arith.constant 3.200000e+01 : f32
    %212 = vector.broadcast %cst_80 : f32 to vector<16x1xf32>
    %213 = arith.divf %211, %212 : vector<16x1xf32>
    %214 = vector.broadcast %213 : vector<16x1xf32> to vector<16x32xf32>
    %215 = arith.subf %205, %214 : vector<16x32xf32>
    %216 = arith.mulf %215, %215 : vector<16x32xf32>
    %cst_81 = arith.constant dense<0.000000e+00> : vector<16xf32>
    %217 = vector.multi_reduction <add>, %216, %cst_81 [1] : vector<16x32xf32> to vector<16xf32>
    %218 = vector.shape_cast %217 : vector<16xf32> to vector<16x1xf32>
    %cst_82 = arith.constant 3.200000e+01 : f32
    %219 = vector.broadcast %cst_82 : f32 to vector<16x1xf32>
    %220 = arith.divf %218, %219 : vector<16x1xf32>
    %221 = vector.broadcast %213 : vector<16x1xf32> to vector<16x32xf32>
    %222 = arith.subf %205, %221 : vector<16x32xf32>
    %cst_83 = arith.constant 9.99999974E-6 : f32
    %223 = vector.broadcast %cst_83 : f32 to vector<16x1xf32>
    %224 = arith.addf %220, %223 : vector<16x1xf32>
    %225 = math.rsqrt %224 : vector<16x1xf32>
    %226 = vector.broadcast %225 : vector<16x1xf32> to vector<16x32xf32>
    %227 = arith.mulf %222, %226 : vector<16x32xf32>
    %228 = vector.broadcast %207 : vector<1x32xf32> to vector<16x32xf32>
    %229 = arith.mulf %227, %228 : vector<16x32xf32>
    %230 = vector.broadcast %209 : vector<1x32xf32> to vector<16x32xf32>
    %231 = arith.addf %229, %230 : vector<16x32xf32>
    %c0_84 = arith.constant 0 : index
    %c0_85 = arith.constant 0 : index
    %c0_86 = arith.constant 0 : index
    %232 = vector.load %arg13[%c0_84, %c0_85, %c0_86] : memref<1x32x64xf32, #tpu.memory_space<vmem>>, vector<1x32x64xf32>
    %233 = vector.shape_cast %232 : vector<1x32x64xf32> to vector<32x64xf32>
    %cst_87 = arith.constant dense<0.000000e+00> : vector<16x64xf32>
    %234 = tpu.matmul %231, %233, %cst_87 {dimension_numbers = #tpu.dot_dimension_numbers<[1], [0], [0], [1], [0, 0, 1, 1], [], []>} : vector<16x32xf32>, vector<32x64xf32>, vector<16x64xf32> -> vector<16x64xf32>
    %c0_88 = arith.constant 0 : index
    %c0_89 = arith.constant 0 : index
    %c0_90 = arith.constant 0 : index
    %235 = vector.load %arg14[%c0_88, %c0_89, %c0_90] : memref<1x1x64xf32, #tpu.memory_space<vmem>>, vector<1x1x64xf32>
    %236 = vector.shape_cast %235 : vector<1x1x64xf32> to vector<1x64xf32>
    %237 = vector.broadcast %236 : vector<1x64xf32> to vector<16x64xf32>
    %238 = arith.addf %234, %237 : vector<16x64xf32>
    %cst_91 = arith.constant 0.000000e+00 : f32
    %239 = vector.broadcast %cst_91 : f32 to vector<16x64xf32>
    %240 = arith.maximumf %238, %239 : vector<16x64xf32>
    %c0_92 = arith.constant 0 : index
    %c0_93 = arith.constant 0 : index
    %c0_94 = arith.constant 0 : index
    %241 = vector.load %arg15[%c0_92, %c0_93, %c0_94] : memref<1x64x32xf32, #tpu.memory_space<vmem>>, vector<1x64x32xf32>
    %242 = vector.shape_cast %241 : vector<1x64x32xf32> to vector<64x32xf32>
    %cst_95 = arith.constant dense<0.000000e+00> : vector<16x32xf32>
    %243 = tpu.matmul %240, %242, %cst_95 {dimension_numbers = #tpu.dot_dimension_numbers<[1], [0], [0], [1], [0, 0, 1, 1], [], []>} : vector<16x64xf32>, vector<64x32xf32>, vector<16x32xf32> -> vector<16x32xf32>
    %c0_96 = arith.constant 0 : index
    %c0_97 = arith.constant 0 : index
    %c0_98 = arith.constant 0 : index
    %244 = vector.load %arg16[%c0_96, %c0_97, %c0_98] : memref<1x1x32xf32, #tpu.memory_space<vmem>>, vector<1x1x32xf32>
    %245 = vector.shape_cast %244 : vector<1x1x32xf32> to vector<1x32xf32>
    %246 = vector.broadcast %245 : vector<1x32xf32> to vector<16x32xf32>
    %247 = arith.addf %243, %246 : vector<16x32xf32>
    %248 = arith.addf %231, %247 : vector<16x32xf32>
    %c0_99 = arith.constant 0 : index
    %c0_100 = arith.constant 0 : index
    %c0_101 = arith.constant 0 : index
    %249 = vector.load %arg17[%c0_99, %c0_100, %c0_101] : memref<1x1x32xf32, #tpu.memory_space<vmem>>, vector<1x1x32xf32>
    %250 = vector.shape_cast %249 : vector<1x1x32xf32> to vector<1x32xf32>
    %c0_102 = arith.constant 0 : index
    %c0_103 = arith.constant 0 : index
    %c0_104 = arith.constant 0 : index
    %251 = vector.load %arg18[%c0_102, %c0_103, %c0_104] : memref<1x1x32xf32, #tpu.memory_space<vmem>>, vector<1x1x32xf32>
    %252 = vector.shape_cast %251 : vector<1x1x32xf32> to vector<1x32xf32>
    %cst_105 = arith.constant dense<0.000000e+00> : vector<16xf32>
    %253 = vector.multi_reduction <add>, %248, %cst_105 [1] : vector<16x32xf32> to vector<16xf32>
    %254 = vector.shape_cast %253 : vector<16xf32> to vector<16x1xf32>
    %cst_106 = arith.constant 3.200000e+01 : f32
    %255 = vector.broadcast %cst_106 : f32 to vector<16x1xf32>
    %256 = arith.divf %254, %255 : vector<16x1xf32>
    %257 = vector.broadcast %256 : vector<16x1xf32> to vector<16x32xf32>
    %258 = arith.subf %248, %257 : vector<16x32xf32>
    %259 = arith.mulf %258, %258 : vector<16x32xf32>
    %cst_107 = arith.constant dense<0.000000e+00> : vector<16xf32>
    %260 = vector.multi_reduction <add>, %259, %cst_107 [1] : vector<16x32xf32> to vector<16xf32>
    %261 = vector.shape_cast %260 : vector<16xf32> to vector<16x1xf32>
    %cst_108 = arith.constant 3.200000e+01 : f32
    %262 = vector.broadcast %cst_108 : f32 to vector<16x1xf32>
    %263 = arith.divf %261, %262 : vector<16x1xf32>
    %264 = vector.broadcast %256 : vector<16x1xf32> to vector<16x32xf32>
    %265 = arith.subf %248, %264 : vector<16x32xf32>
    %cst_109 = arith.constant 9.99999974E-6 : f32
    %266 = vector.broadcast %cst_109 : f32 to vector<16x1xf32>
    %267 = arith.addf %263, %266 : vector<16x1xf32>
    %268 = math.rsqrt %267 : vector<16x1xf32>
    %269 = vector.broadcast %268 : vector<16x1xf32> to vector<16x32xf32>
    %270 = arith.mulf %265, %269 : vector<16x32xf32>
    %271 = vector.broadcast %250 : vector<1x32xf32> to vector<16x32xf32>
    %272 = arith.mulf %270, %271 : vector<16x32xf32>
    %273 = vector.broadcast %252 : vector<1x32xf32> to vector<16x32xf32>
    %274 = arith.addf %272, %273 : vector<16x32xf32>
    %275 = vector.shape_cast %274 : vector<16x32xf32> to vector<2x8x32xf32>
    %c0_110 = arith.constant 0 : index
    %c0_111 = arith.constant 0 : index
    %c0_112 = arith.constant 0 : index
    %276 = vector.load %arg22[%c0_110, %c0_111, %c0_112] : memref<2x8x32xf32, #tpu.memory_space<vmem>>, vector<2x8x32xf32>
    tpu.vector_store %arg22[%c0_110, %c0_111, %c0_112], %275 {strides = array<i32>} : memref<2x8x32xf32, #tpu.memory_space<vmem>>, vector<2x8x32xf32>,
    %c1_i32 = arith.constant 1 : i32
    %277 = arith.cmpi eq, %arg0, %c1_i32 : i32
    %278 = arith.extui %277 : i1 to i32
    %c0_i32_113 = arith.constant 0 : i32
    %279 = arith.cmpi ne, %278, %c0_i32_113 : i32
    scf.if %279 {
      %280 = vector.shape_cast %274 : vector<16x32xf32> to vector<2x8x32xf32>
      %cst_114 = arith.constant 0.000000e+00 : f32
      %281 = vector.broadcast %cst_114 : f32 to vector<2x16xf32>
      %282 = vector.extract_strided_slice %280 {offsets = [0, 0, 0], sizes = [2, 1, 32], strides = [1, 1, 1]} : vector<2x8x32xf32> to vector<2x1x32xf32>
      %283 = vector.shape_cast %282 : vector<2x1x32xf32> to vector<2x32xf32>
      %c0_115 = arith.constant 0 : index
      %c0_116 = arith.constant 0 : index
      %c0_117 = arith.constant 0 : index
      %284 = vector.load %arg19[%c0_115, %c0_116, %c0_117] : memref<8x32x16xf32, #tpu.memory_space<vmem>>, vector<1x32x16xf32>
      %285 = vector.shape_cast %284 : vector<1x32x16xf32> to vector<32x16xf32>
      %cst_118 = arith.constant dense<0.000000e+00> : vector<2x16xf32>
      %286 = tpu.matmul %283, %285, %cst_118 {dimension_numbers = #tpu.dot_dimension_numbers<[1], [0], [0], [1], [0, 0, 1, 1], [], []>} : vector<2x32xf32>, vector<32x16xf32>, vector<2x16xf32> -> vector<2x16xf32>
      %287 = arith.addf %281, %286 : vector<2x16xf32>
      %288 = vector.extract_strided_slice %280 {offsets = [0, 1, 0], sizes = [2, 1, 32], strides = [1, 1, 1]} : vector<2x8x32xf32> to vector<2x1x32xf32>
      %289 = vector.shape_cast %288 : vector<2x1x32xf32> to vector<2x32xf32>
      %c1 = arith.constant 1 : index
      %c0_119 = arith.constant 0 : index
      %c0_120 = arith.constant 0 : index
      %290 = vector.load %arg19[%c1, %c0_119, %c0_120] : memref<8x32x16xf32, #tpu.memory_space<vmem>>, vector<1x32x16xf32>
      %291 = vector.shape_cast %290 : vector<1x32x16xf32> to vector<32x16xf32>
      %cst_121 = arith.constant dense<0.000000e+00> : vector<2x16xf32>
      %292 = tpu.matmul %289, %291, %cst_121 {dimension_numbers = #tpu.dot_dimension_numbers<[1], [0], [0], [1], [0, 0, 1, 1], [], []>} : vector<2x32xf32>, vector<32x16xf32>, vector<2x16xf32> -> vector<2x16xf32>
      %293 = arith.addf %287, %292 : vector<2x16xf32>
      %294 = vector.extract_strided_slice %280 {offsets = [0, 2, 0], sizes = [2, 1, 32], strides = [1, 1, 1]} : vector<2x8x32xf32> to vector<2x1x32xf32>
      %295 = vector.shape_cast %294 : vector<2x1x32xf32> to vector<2x32xf32>
      %c2 = arith.constant 2 : index
      %c0_122 = arith.constant 0 : index
      %c0_123 = arith.constant 0 : index
      %296 = vector.load %arg19[%c2, %c0_122, %c0_123] : memref<8x32x16xf32, #tpu.memory_space<vmem>>, vector<1x32x16xf32>
      %297 = vector.shape_cast %296 : vector<1x32x16xf32> to vector<32x16xf32>
      %cst_124 = arith.constant dense<0.000000e+00> : vector<2x16xf32>
      %298 = tpu.matmul %295, %297, %cst_124 {dimension_numbers = #tpu.dot_dimension_numbers<[1], [0], [0], [1], [0, 0, 1, 1], [], []>} : vector<2x32xf32>, vector<32x16xf32>, vector<2x16xf32> -> vector<2x16xf32>
      %299 = arith.addf %293, %298 : vector<2x16xf32>
      %300 = vector.extract_strided_slice %280 {offsets = [0, 3, 0], sizes = [2, 1, 32], strides = [1, 1, 1]} : vector<2x8x32xf32> to vector<2x1x32xf32>
      %301 = vector.shape_cast %300 : vector<2x1x32xf32> to vector<2x32xf32>
      %c3 = arith.constant 3 : index
      %c0_125 = arith.constant 0 : index
      %c0_126 = arith.constant 0 : index
      %302 = vector.load %arg19[%c3, %c0_125, %c0_126] : memref<8x32x16xf32, #tpu.memory_space<vmem>>, vector<1x32x16xf32>
      %303 = vector.shape_cast %302 : vector<1x32x16xf32> to vector<32x16xf32>
      %cst_127 = arith.constant dense<0.000000e+00> : vector<2x16xf32>
      %304 = tpu.matmul %301, %303, %cst_127 {dimension_numbers = #tpu.dot_dimension_numbers<[1], [0], [0], [1], [0, 0, 1, 1], [], []>} : vector<2x32xf32>, vector<32x16xf32>, vector<2x16xf32> -> vector<2x16xf32>
      %305 = arith.addf %299, %304 : vector<2x16xf32>
      %306 = vector.extract_strided_slice %280 {offsets = [0, 4, 0], sizes = [2, 1, 32], strides = [1, 1, 1]} : vector<2x8x32xf32> to vector<2x1x32xf32>
      %307 = vector.shape_cast %306 : vector<2x1x32xf32> to vector<2x32xf32>
      %c4 = arith.constant 4 : index
      %c0_128 = arith.constant 0 : index
      %c0_129 = arith.constant 0 : index
      %308 = vector.load %arg19[%c4, %c0_128, %c0_129] : memref<8x32x16xf32, #tpu.memory_space<vmem>>, vector<1x32x16xf32>
      %309 = vector.shape_cast %308 : vector<1x32x16xf32> to vector<32x16xf32>
      %cst_130 = arith.constant dense<0.000000e+00> : vector<2x16xf32>
      %310 = tpu.matmul %307, %309, %cst_130 {dimension_numbers = #tpu.dot_dimension_numbers<[1], [0], [0], [1], [0, 0, 1, 1], [], []>} : vector<2x32xf32>, vector<32x16xf32>, vector<2x16xf32> -> vector<2x16xf32>
      %311 = arith.addf %305, %310 : vector<2x16xf32>
      %312 = vector.extract_strided_slice %280 {offsets = [0, 5, 0], sizes = [2, 1, 32], strides = [1, 1, 1]} : vector<2x8x32xf32> to vector<2x1x32xf32>
      %313 = vector.shape_cast %312 : vector<2x1x32xf32> to vector<2x32xf32>
      %c5 = arith.constant 5 : index
      %c0_131 = arith.constant 0 : index
      %c0_132 = arith.constant 0 : index
      %314 = vector.load %arg19[%c5, %c0_131, %c0_132] : memref<8x32x16xf32, #tpu.memory_space<vmem>>, vector<1x32x16xf32>
      %315 = vector.shape_cast %314 : vector<1x32x16xf32> to vector<32x16xf32>
      %cst_133 = arith.constant dense<0.000000e+00> : vector<2x16xf32>
      %316 = tpu.matmul %313, %315, %cst_133 {dimension_numbers = #tpu.dot_dimension_numbers<[1], [0], [0], [1], [0, 0, 1, 1], [], []>} : vector<2x32xf32>, vector<32x16xf32>, vector<2x16xf32> -> vector<2x16xf32>
      %317 = arith.addf %311, %316 : vector<2x16xf32>
      %318 = vector.extract_strided_slice %280 {offsets = [0, 6, 0], sizes = [2, 1, 32], strides = [1, 1, 1]} : vector<2x8x32xf32> to vector<2x1x32xf32>
      %319 = vector.shape_cast %318 : vector<2x1x32xf32> to vector<2x32xf32>
      %c6 = arith.constant 6 : index
      %c0_134 = arith.constant 0 : index
      %c0_135 = arith.constant 0 : index
      %320 = vector.load %arg19[%c6, %c0_134, %c0_135] : memref<8x32x16xf32, #tpu.memory_space<vmem>>, vector<1x32x16xf32>
      %321 = vector.shape_cast %320 : vector<1x32x16xf32> to vector<32x16xf32>
      %cst_136 = arith.constant dense<0.000000e+00> : vector<2x16xf32>
      %322 = tpu.matmul %319, %321, %cst_136 {dimension_numbers = #tpu.dot_dimension_numbers<[1], [0], [0], [1], [0, 0, 1, 1], [], []>} : vector<2x32xf32>, vector<32x16xf32>, vector<2x16xf32> -> vector<2x16xf32>
      %323 = arith.addf %317, %322 : vector<2x16xf32>
      %324 = vector.extract_strided_slice %280 {offsets = [0, 7, 0], sizes = [2, 1, 32], strides = [1, 1, 1]} : vector<2x8x32xf32> to vector<2x1x32xf32>
      %325 = vector.shape_cast %324 : vector<2x1x32xf32> to vector<2x32xf32>
      %c7 = arith.constant 7 : index
      %c0_137 = arith.constant 0 : index
      %c0_138 = arith.constant 0 : index
      %326 = vector.load %arg19[%c7, %c0_137, %c0_138] : memref<8x32x16xf32, #tpu.memory_space<vmem>>, vector<1x32x16xf32>
      %327 = vector.shape_cast %326 : vector<1x32x16xf32> to vector<32x16xf32>
      %cst_139 = arith.constant dense<0.000000e+00> : vector<2x16xf32>
      %328 = tpu.matmul %325, %327, %cst_139 {dimension_numbers = #tpu.dot_dimension_numbers<[1], [0], [0], [1], [0, 0, 1, 1], [], []>} : vector<2x32xf32>, vector<32x16xf32>, vector<2x16xf32> -> vector<2x16xf32>
      %329 = arith.addf %323, %328 : vector<2x16xf32>
      %c0_140 = arith.constant 0 : index
      %c0_141 = arith.constant 0 : index
      %330 = vector.load %arg20[%c0_140, %c0_141] : memref<1x16xf32, #tpu.memory_space<vmem>>, vector<1x16xf32>
      %331 = vector.broadcast %330 : vector<1x16xf32> to vector<2x16xf32>
      %332 = arith.addf %329, %331 : vector<2x16xf32>
      %cst_142 = arith.constant 0.000000e+00 : f32
      %333 = vector.broadcast %cst_142 : f32 to vector<2x16xf32>
      %334 = arith.subf %333, %332 : vector<2x16xf32>
      %335 = math.exp %334 : vector<2x16xf32>
      %cst_143 = arith.constant 1.000000e+00 : f32
      %336 = vector.broadcast %cst_143 : f32 to vector<2x16xf32>
      %337 = arith.addf %336, %335 : vector<2x16xf32>
      %338 = tpu.reciprocal %337 {approx = true} : vector<2x16xf32> -> vector<2x16xf32>
      %c0_144 = arith.constant 0 : index
      %c0_145 = arith.constant 0 : index
      %339 = vector.load %arg21[%c0_144, %c0_145] : memref<2x16xf32, #tpu.memory_space<vmem>>, vector<2x16xf32>
      tpu.vector_store %arg21[%c0_144, %c0_145], %338 {strides = array<i32>} : memref<2x16xf32, #tpu.memory_space<vmem>>, vector<2x16xf32>,
    } else {
    }
    return
  }
  func.func @transform_0(%arg0: i32) -> (i32, i32, i32) {
    %c0_i32 = arith.constant 0 : i32
    %c0_i32_0 = arith.constant 0 : i32
    %c0_i32_1 = arith.constant 0 : i32
    %c0_i32_2 = arith.constant 0 : i32
    return %c0_i32, %c0_i32_0, %c0_i32_1 : i32, i32, i32
  }
  func.func @transform_1(%arg0: i32) -> (i32, i32, i32) {
    %c0_i32 = arith.constant 0 : i32
    %c0_i32_0 = arith.constant 0 : i32
    %c0_i32_1 = arith.constant 0 : i32
    %c0_i32_2 = arith.constant 0 : i32
    return %c0_i32, %c0_i32_0, %c0_i32_1 : i32, i32, i32
  }
  func.func @transform_2(%arg0: i32) -> (i32, i32, i32, i32) {
    %c0_i32 = arith.constant 0 : i32
    %c0_i32_0 = arith.constant 0 : i32
    %c0_i32_1 = arith.constant 0 : i32
    %c0_i32_2 = arith.constant 0 : i32
    return %arg0, %c0_i32, %c0_i32_0, %c0_i32_1 : i32, i32, i32, i32
  }
  func.func @transform_3(%arg0: i32) -> (i32, i32, i32, i32) {
    %c0_i32 = arith.constant 0 : i32
    %c0_i32_0 = arith.constant 0 : i32
    %c0_i32_1 = arith.constant 0 : i32
    %c0_i32_2 = arith.constant 0 : i32
    return %arg0, %c0_i32, %c0_i32_0, %c0_i32_1 : i32, i32, i32, i32
  }
  func.func @transform_4(%arg0: i32) -> (i32, i32, i32, i32) {
    %c0_i32 = arith.constant 0 : i32
    %c0_i32_0 = arith.constant 0 : i32
    %c0_i32_1 = arith.constant 0 : i32
    %c0_i32_2 = arith.constant 0 : i32
    return %arg0, %c0_i32, %c0_i32_0, %c0_i32_1 : i32, i32, i32, i32
  }
  func.func @transform_5(%arg0: i32) -> (i32, i32, i32, i32) {
    %c0_i32 = arith.constant 0 : i32
    %c0_i32_0 = arith.constant 0 : i32
    %c0_i32_1 = arith.constant 0 : i32
    %c0_i32_2 = arith.constant 0 : i32
    return %arg0, %c0_i32, %c0_i32_0, %c0_i32_1 : i32, i32, i32, i32
  }
  func.func @transform_6(%arg0: i32) -> (i32, i32, i32, i32) {
    %c0_i32 = arith.constant 0 : i32
    %c0_i32_0 = arith.constant 0 : i32
    %c0_i32_1 = arith.constant 0 : i32
    %c0_i32_2 = arith.constant 0 : i32
    return %arg0, %c0_i32, %c0_i32_0, %c0_i32_1 : i32, i32, i32, i32
  }
  func.func @transform_7(%arg0: i32) -> (i32, i32, i32, i32) {
    %c0_i32 = arith.constant 0 : i32
    %c0_i32_0 = arith.constant 0 : i32
    %c0_i32_1 = arith.constant 0 : i32
    %c0_i32_2 = arith.constant 0 : i32
    return %arg0, %c0_i32, %c0_i32_0, %c0_i32_1 : i32, i32, i32, i32
  }
  func.func @transform_8(%arg0: i32) -> (i32, i32, i32, i32) {
    %c0_i32 = arith.constant 0 : i32
    %c0_i32_0 = arith.constant 0 : i32
    %c0_i32_1 = arith.constant 0 : i32
    %c0_i32_2 = arith.constant 0 : i32
    return %arg0, %c0_i32, %c0_i32_0, %c0_i32_1 : i32, i32, i32, i32
  }
  func.func @transform_9(%arg0: i32) -> (i32, i32, i32) {
    %c0_i32 = arith.constant 0 : i32
    %c0_i32_0 = arith.constant 0 : i32
    %c0_i32_1 = arith.constant 0 : i32
    return %arg0, %c0_i32, %c0_i32_0 : i32, i32, i32
  }
  func.func @transform_10(%arg0: i32) -> (i32, i32, i32) {
    %c0_i32 = arith.constant 0 : i32
    %c0_i32_0 = arith.constant 0 : i32
    %c0_i32_1 = arith.constant 0 : i32
    return %arg0, %c0_i32, %c0_i32_0 : i32, i32, i32
  }
  func.func @transform_11(%arg0: i32) -> (i32, i32, i32) {
    %c0_i32 = arith.constant 0 : i32
    %c0_i32_0 = arith.constant 0 : i32
    %c0_i32_1 = arith.constant 0 : i32
    return %arg0, %c0_i32, %c0_i32_0 : i32, i32, i32
  }
  func.func @transform_12(%arg0: i32) -> (i32, i32, i32) {
    %c0_i32 = arith.constant 0 : i32
    %c0_i32_0 = arith.constant 0 : i32
    %c0_i32_1 = arith.constant 0 : i32
    return %arg0, %c0_i32, %c0_i32_0 : i32, i32, i32
  }
  func.func @transform_13(%arg0: i32) -> (i32, i32, i32) {
    %c0_i32 = arith.constant 0 : i32
    %c0_i32_0 = arith.constant 0 : i32
    %c0_i32_1 = arith.constant 0 : i32
    return %arg0, %c0_i32, %c0_i32_0 : i32, i32, i32
  }
  func.func @transform_14(%arg0: i32) -> (i32, i32, i32) {
    %c0_i32 = arith.constant 0 : i32
    %c0_i32_0 = arith.constant 0 : i32
    %c0_i32_1 = arith.constant 0 : i32
    return %arg0, %c0_i32, %c0_i32_0 : i32, i32, i32
  }
  func.func @transform_15(%arg0: i32) -> (i32, i32, i32) {
    %c0_i32 = arith.constant 0 : i32
    %c0_i32_0 = arith.constant 0 : i32
    %c0_i32_1 = arith.constant 0 : i32
    return %arg0, %c0_i32, %c0_i32_0 : i32, i32, i32
  }
  func.func @transform_16(%arg0: i32) -> (i32, i32, i32) {
    %c0_i32 = arith.constant 0 : i32
    %c0_i32_0 = arith.constant 0 : i32
    %c0_i32_1 = arith.constant 0 : i32
    return %arg0, %c0_i32, %c0_i32_0 : i32, i32, i32
  }
  func.func @transform_17(%arg0: i32) -> (i32, i32, i32) {
    %c0_i32 = arith.constant 0 : i32
    %c0_i32_0 = arith.constant 0 : i32
    %c0_i32_1 = arith.constant 0 : i32
    return %arg0, %c0_i32, %c0_i32_0 : i32, i32, i32
  }
  func.func @transform_18(%arg0: i32) -> (i32, i32, i32) {
    %c0_i32 = arith.constant 0 : i32
    %c0_i32_0 = arith.constant 0 : i32
    %c0_i32_1 = arith.constant 0 : i32
    %c0_i32_2 = arith.constant 0 : i32
    return %c0_i32, %c0_i32_0, %c0_i32_1 : i32, i32, i32
  }
  func.func @transform_19(%arg0: i32) -> (i32, i32) {
    %c0_i32 = arith.constant 0 : i32
    %c0_i32_0 = arith.constant 0 : i32
    %c0_i32_1 = arith.constant 0 : i32
    return %c0_i32, %c0_i32_0 : i32, i32
  }
  func.func @transform_20(%arg0: i32) -> (i32, i32) {
    %c0_i32 = arith.constant 0 : i32
    %c0_i32_0 = arith.constant 0 : i32
    %c0_i32_1 = arith.constant 0 : i32
    return %c0_i32, %c0_i32_0 : i32, i32
  }
}

</mosaic_0001>

<bundles_post_ra>
// kernel: tpu_custom_call.1
= control target key start
LH: loop header
LB: loop body
LE: loop exit
PB: predicated region body
PF: predicated region fallthrough
CT: control target
= control target key end

     0   :  { %s6364_s0 = inlined_call_operand.vmem [shape: f32[2,8,32], index: 0, kind: input, shape index: {}]   ;;  %s6365_s1 = inlined_call_operand.vmem [shape: f32[2,1,8], index: 1, kind: input, shape index: {}]   ;;  %s6366_s2 = inlined_call_operand.vmem [shape: f32[2,4,32,8], index: 2, kind: input, shape index: {}]   ;;  %s6367_s3 = inlined_call_operand.vmem [shape: f32[2,4,1,8], index: 3, kind: input, shape index: {}]   ;;  %s6368_s4 = inlined_call_operand.vmem [shape: f32[2,4,32,8], index: 4, kind: input, shape index: {}]   ;;  %s6369_s5 = inlined_call_operand.vmem [shape: f32[2,4,1,8], index: 5, kind: input, shape index: {}]   ;;  %s6370_s6 = inlined_call_operand.vmem [shape: f32[2,4,32,8], index: 6, kind: input, shape index: {}]   ;;  %s6371_s7 = inlined_call_operand.vmem [shape: f32[2,4,1,8], index: 7, kind: input, shape index: {}]   ;;  %s6372_s8 = inlined_call_operand.vmem [shape: f32[2,4,8,32], index: 8, kind: input, shape index: {}]   ;;  %s6373_s9 = inlined_call_operand.vmem [shape: f32[2,1,32], index: 9, kind: input, shape index: {}]   ;;  %s6374_s10 = inlined_call_operand.vmem [shape: f32[2,1,32], index: 10, kind: input, shape index: {}]   ;;  %s6375_s11 = inlined_call_operand.vmem [shape: f32[2,1,32], index: 11, kind: input, shape index: {}]   ;;  %s6376_s12 = inlined_call_operand.vmem [shape: f32[2,32,64], index: 12, kind: input, shape index: {}]   ;;  %s6377_s13 = inlined_call_operand.vmem [shape: f32[2,1,64], index: 13, kind: input, shape index: {}]   ;;  %s6378_s14 = inlined_call_operand.vmem [shape: f32[2,64,32], index: 14, kind: input, shape index: {}]   ;;  %s6379_s15 = inlined_call_operand.vmem [shape: f32[2,1,32], index: 15, kind: input, shape index: {}]   ;;  %s6380_s16 = inlined_call_operand.vmem [shape: f32[2,1,32], index: 16, kind: input, shape index: {}]   ;;  %s6381_s17 = inlined_call_operand.vmem [shape: f32[2,1,32], index: 17, kind: input, shape index: {}]   ;;  %s6382_s18 = inlined_call_operand.vmem [shape: f32[8,32,16], index: 18, kind: input, shape index: {}]   ;;  %s6383_s19 = inlined_call_operand.vmem [shape: f32[1,16], index: 19, kind: input, shape index: {}]   ;;  %s6384_s20 = inlined_call_operand.hbm [shape: f32[2,16], index: 20, kind: output, shape index: {}]  }
   0x1   :  { %6395 = sst [smem:[#allocation11_spill]] %s6364_s0 }
   0x2   :  { %6396 = sst [smem:[#allocation12_spill]] %s6365_s1 }
   0x3   :  { %6397 = sst [smem:[#allocation13_spill]] %s6366_s2 }
   0x4   :  { %6398 = sst [smem:[#allocation14_spill]] %s6367_s3 }
   0x5   :  { %6399 = sst [smem:[#allocation15_spill]] %s6368_s4 }
   0x6   :  { %6400 = sst [smem:[#allocation16_spill]] %s6369_s5 }
   0x7   :  { %6401 = sst [smem:[#allocation17_spill]] %s6370_s6 }
   0x8   :  { %6402 = sst [smem:[#allocation18_spill]] %s6371_s7 }
   0x9   :  { %6403 = sst [smem:[#allocation19_spill]] %s6372_s8 }
   0xa   :  { %6404 = sst [smem:[#allocation20_spill]] %s6382_s18 }
   0xb   :  { %6405 = sst [smem:[#allocation21_spill]] %s6383_s19 }
   0xc   :  { %6406 = sst [smem:[#allocation22_spill]] %s6384_s20 }
   0xd   :  { %25 = vsyncpa [#allocation4], 0  ;;  %s5773_s1 = smov 0  }
   0xe LB: > { %6407 = sst [smem:[#allocation6_spill]] %s5660_s1  ;;  %s5779_s22 = sadd.s32 4294967295, %s5660_s1   ;;  %s5660_s1 = sphi %s5773_s1, %s31_s1  }
   0xf   : > { %6408 = sst [smem:[#allocation7_spill]] %s5779_s22  ;;  %p4718_p0 = scmp.ge.s32.totalorder %s5660_s1, 1 }
  0x10   : > { %p691_p1 = scmp.lt.s32.totalorder %s5660_s1, 3 }
  0x12   : > { %p692_p2 = pnand %p4718_p0, %p691_p1 }
  0x14   : > { %695 = sbr.rel (%p692_p2) target bundleno = 5336 (0x14d8), region = 100 }
  0x1b   : > { %p802_p3 = scmp.lt.s32.totalorder %s5779_s22, 1  ;;  %s6409_s26 = sld [smem:[#allocation13_spill]] }
  0x1c   : > { %s6411_s29 = sld [smem:[#allocation14_spill]]  ;;  %s6413_s1 = sld [smem:[#allocation15_spill]] }
  0x1d   : > { %s5785_s23 = scalar_select %p802_p3, %s5779_s22, 1 }
  0x1e   : > { %s6415_s5 = sld [smem:[#allocation16_spill]]  ;;  %s6416_s6 = sld [smem:[#allocation17_spill]] }
  0x1f   : > { %s4858_s24 = sshll.u32 %s5785_s23, 7  ;;  %s4721_s2 = sshll.u32 %s5785_s23, 2 }
  0x20   : > { %s6417_s7 = sld [smem:[#allocation18_spill]]  ;;  %s6418_s8 = sld [smem:[#allocation19_spill]] }
  0x21   : > { %s5792_s27 = scalar_lea.vmem %s6409_s26, %s4858_s24  ;;  %s858_s25 = scalar_lea.vmem %s6379_s15, %s5785_s23 }
  0x22   : > { %6410 = sst [smem:[#allocation8_spill]] %s5792_s27  ;;  %s5797_s30 = scalar_lea.vmem %s6411_s29, %s4721_s2 }
  0x23   : > { %6412 = sst [smem:[#allocation9_spill]] %s5797_s30  ;;  %s5802_s20 = scalar_lea.vmem %s6413_s1, %s4858_s24 }
  0x24   : > { %6414 = sst [smem:[#allocation10_spill]] %s5802_s20  ;;  %s5807_s22 = scalar_lea.vmem %s6415_s5, %s4721_s2 }
  0x25   : > { %s5812_s26 = scalar_lea.vmem %s6416_s6, %s4858_s24  ;;  %s4861_s30 = sshll.u32 %s5785_s23, 5 }
  0x26   : > { %s5817_s29 = scalar_lea.vmem %s6417_s7, %s4721_s2  ;;  %s5827_s18 = scalar_lea.vmem %s6418_s8, %s4861_s30 }
  0x27   : > { %s5840_s6 = scalar_lea.vmem %s6376_s12, %s4861_s30  ;;  %s4863_s20 = sshll.u32 %s5785_s23, 6 }
  0x28   : > { %s5850_s8 = scalar_lea.vmem %s6378_s14, %s4863_s20  ;;  %s861_s2 = scalar_lea.vmem %s6380_s16, %s5785_s23 }
  0x29   : > { %s864_s24 = scalar_lea.vmem %s6381_s17, %s5785_s23  ;;  %s6419_s0 = sld [smem:[#allocation7_spill]] }
  0x2f   : > { %p4734_p4 = scmp.ne.s32.totalorder %s6419_s0, 0 }
  0x30   : > { %s6420_s7 = sld [smem:[#allocation11_spill]] (!%p4734_p4)  ;;  %vm871_vm0 = vcmask (!%p4734_p4), 261120  }
  0x31   : > { %868 = sbr.rel (%p4734_p4) target bundleno = 56 (0x38), region = 104 }
  0x36   : > { %v869_v0 = vld [vmem:[%s6420_s7] sm:$0xff] (!%p4734_p4)  ;;  %v870_v1 = vld [vmem:[%s6420_s7 + $0x8] sm:$0xff] (!%p4734_p4) }
  0x37   : > { %872 = vst.msk [vmem:[#allocation2] sm:$0xff] (!%p4734_p4), %vm871_vm0, %v869_v0  ;;  %873 = vst.msk [vmem:[#allocation2 + $0x8] sm:$0xff] (!%p4734_p4), %vm871_vm0, %v870_v1 }
  0x38 PF: > { %s6421_s28 = sld [smem:[#allocation8_spill]]  ;;  %s6422_s5 = sld [smem:[#allocation10_spill]]  ;;  %vm948_vm1 = vcmask 261120   ;;  %v5662_v16 = vmov 0.0   ;;  %vm5663_vm2 = vmmov 0   ;;  %vm1206_vm3 = vcmask 64512  }
  0x39   : > { %s6423_s1 = sld [smem:[#allocation9_spill]]  ;;  %v4738_v20 = vld [vmem:[%s5807_s22] ss:$0 sm:$0xff]  ;;  %v919_v30 = vld [vmem:[%s5812_s26 + $0x8] sm:$0xff]  ;;  %v920_v31 = vld [vmem:[%s5812_s26 + $0x10] sm:$0xff]  ;;  %s6424_s30 = sld [smem:[#allocation12_spill]] }
  0x3a   : > { %v918_v29 = vld [vmem:[%s5812_s26] sm:$0xff]  ;;  %v921_v33 = vld [vmem:[%s5812_s26 + $0x18] sm:$0xff]  ;;  %s6426_s21 = scalar_lea.vmem %s6374_s10, %s5785_s23  ;;  %s6428_s19 = scalar_lea.vmem %s6377_s13, %s5785_s23  ;;  %vm3715_vm4 = vcmask 523264  }
  0x3b   : > { %v5402_v32 = vpack.c.bf16 %v919_v30, %v918_v29  ;;  %v5406_v34 = vpack.c.bf16 %v921_v33, %v920_v31  ;;  %v4741_v56 = vld [vmem:[%s5817_s29] ss:$0 sm:$0xff] }
  0x3c   : > { %v922_v33 = vld [vmem:[%s5812_s26 + $0x20] sm:$0xff] }
  0x3d   : > { %5403 = vmatprep.subr.bf16.mxu0 %v5402_v32 }
  0x3e   : > { %v878_v2 = vld [vmem:[%s6421_s28] sm:$0xff]  ;;  %v879_v3 = vld [vmem:[%s6421_s28 + $0x8] sm:$0xff]  ;;  %v880_v4 = vld [vmem:[%s6421_s28 + $0x10] sm:$0xff]  ;;  %5405 = vmatpush3.bf16.msra.mxu0 %v5402_v32 }
  0x3f   : > { %v5386_v5 = vpack.c.bf16 %v879_v3, %v878_v2  ;;  %v881_v6 = vld [vmem:[%s6421_s28 + $0x18] sm:$0xff]  ;;  %v5875_v7 = vld [vmem:[#allocation2] sm:$0xff]  ;;  %v899_v10 = vld [vmem:[%s6422_s5 + $0x8] sm:$0xff]  ;;  %5407 = vmatprep.subr.bf16.mxu0 %v5406_v34 }
  0x40   : > { %v5390_v8 = vpack.c.bf16 %v881_v6, %v880_v4  ;;  %5044 = vmatprep.mubr.msk.f32.mxu1 %vm948_vm1, %v5875_v7  ;;  %v898_v9 = vld [vmem:[%s6422_s5] sm:$0xff]  ;;  %5066 = vmatprep.mubr.msk.f32.mxu0 %vm948_vm1, %v5875_v7  ;;  %v900_v12 = vld [vmem:[%s6422_s5 + $0x10] sm:$0xff]  ;;  %v901_v13 = vld [vmem:[%s6422_s5 + $0x18] sm:$0xff] }
  0x41   : > { %5387 = vmatprep.subr.bf16.mxu1 %v5386_v5  ;;  %v5394_v11 = vpack.c.bf16 %v899_v10, %v898_v9  ;;  %v5885_v14 = vld [vmem:[#allocation2 + $0x8] sm:$0xff]  ;;  %v5398_v15 = vpack.c.bf16 %v901_v13, %v900_v12  ;;  %v4735_v19 = vld [vmem:[%s6423_s1] ss:$0 sm:$0xff]  ;;  %v5920_v37 = vld [vmem:[%s6424_s30 + $0x1] ss:$0 sm:$0xff] }
  0x42   : > { %5389 = vmatpush3.bf16.msra.mxu1 %v5386_v5  ;;  %5409 = vmatpush3.bf16.msra.mxu0 %v5406_v34  ;;  %v5925_v38 = vld [vmem:[%s6424_s30] ss:$0 sm:$0xff]  ;;  %v903_v60 = vld [vmem:[%s6422_s5 + $0x28] sm:$0xff]  ;;  %v904_v4 = vld [vmem:[%s6422_s5 + $0x30] sm:$0xff] }
  0x43   : > { %5391 = vmatprep.subr.bf16.mxu1 %v5390_v8  ;;  %5079 = vmatprep.subr.mxu0 %v5662_v16  ;;  %v902_v59 = vld [vmem:[%s6422_s5 + $0x20] sm:$0xff]  ;;  %v883_v0 = vld [vmem:[%s6421_s28 + $0x28] sm:$0xff]  ;;  %v905_v5 = vld [vmem:[%s6422_s5 + $0x38] sm:$0xff] }
  0x44   : > { %v5418_v62 = vpack.c.bf16 %v903_v60, %v902_v59  ;;  %v882_v63 = vld [vmem:[%s6421_s28 + $0x20] sm:$0xff]  ;;  %v5422_v9 = vpack.c.bf16 %v905_v5, %v904_v4  ;;  %v884_v10 = vld [vmem:[%s6421_s28 + $0x30] sm:$0xff]  ;;  %v923_v34 = vld [vmem:[%s5812_s26 + $0x28] sm:$0xff] }
  0x45   : > { %5067 = vmatmul.mubr.msk.f32.vlgmr.msra.gmra.mrb[0].mxu0 %vm948_vm1, %v5885_v14  ;;  %v5410_v1 = vpack.c.bf16 %v883_v0, %v882_v63  ;;  %v4758_v60 = vld [vmem:[%s5817_s29 + $0x1] ss:$0 sm:$0xff] }
  0x46   : > { %5393 = vmatpush3.bf16.msra.mxu1 %v5390_v8  ;;  %5081 = vmatprep.mubr.msk.f32.mxu0 %vm5663_vm2, %v5662_v16 }
  0x47   : > { %5395 = vmatprep.subr.bf16.mxu1 %v5394_v11 }
  0x49   : > { %5045 = vmatmul.mubr.msk.f32.vlgmr.msra.gmra.mrb[0].mxu1 %vm948_vm1, %v5885_v14 }
  0x4a   : > { %5397 = vmatpush3.bf16.msra.mxu1 %v5394_v11  ;;  %5055 = vmatprep.mubr.msk.f32.mxu1 %vm948_vm1, %v5875_v7  ;;  %v885_v11 = vld [vmem:[%s6421_s28 + $0x38] sm:$0xff] }
  0x4b   : > { %5399 = vmatprep.subr.bf16.mxu1 %v5398_v15 }
  0x4e   : > { %5401 = vmatpush3.bf16.msra.mxu1 %v5398_v15  ;;  %v5414_v15 = vpack.c.bf16 %v885_v11, %v884_v10  ;;  %v887_v10 = vld [vmem:[%s6421_s28 + $0x48] sm:$0xff] }
  0x4f   : > { %5069 = vmatprep.subr.mxu1 %v5662_v16 }
  0x51   : > { %5056 = vmatmul.mubr.msk.f32.vlgmr.msra.gmra.mrb[2].mxu1 %vm948_vm1, %v5885_v14 }
  0x52   : > { %5071 = vmatprep.mubr.msk.f32.mxu1 %vm5663_vm2, %v5662_v16 }
 0x118   : > { %v5068_v55 = vpop.f32.mrb[0].mxu0 }
 0x119   : > { %v1191_v57 = vadd.f32 %v5068_v55, %v4741_v56  ;;  %v1185_v58 = vpop.f32.mrb[1].mxu0 }
 0x11a   : > { %v1186_v61 = vadd.f32 %v4741_v56, %v1185_v58 }
 0x11c   : > { %v5046_v17 = vpop.f32.mrb[0].mxu1  ;;  %5080 = vmatpush3.msra.mxu0 %v1186_v61 }
 0x11d   : > { %v1021_v18 = vpop.f32.mrb[1].mxu1  ;;  %v1027_v25 = vadd.f32 %v5046_v17, %v4735_v19  ;;  %5411 = vmatprep.subr.bf16.mxu0 %v5410_v1 }
 0x11e   : > { %v1022_v22 = vadd.f32 %v4735_v19, %v1021_v18 }
 0x11f   : > { %v1031_v28 = vmul.f32 0.35355338, %v1027_v25  ;;  %v4752_v25 = vld [vmem:[%s6423_s1 + $0x1] ss:$0 sm:$0xff] }
 0x120   : > { %v1030_v26 = vmul.f32 0.35355338, %v1022_v22 }
 0x124   : > { %v5057_v21 = vpop.f32.mrb[2].mxu1 }
 0x125   : > { %v1104_v23 = vpop.f32.mrb[3].mxu1  ;;  %v1110_v27 = vadd.f32 %v5057_v21, %v4738_v20  ;;  %v4755_v21 = vld [vmem:[%s5807_s22 + $0x1] ss:$0 sm:$0xff] }
 0x126   : > { %v1105_v24 = vadd.f32 %v4738_v20, %v1104_v23 }
 0x128   : > { %5070 = vmatpush3.xpose.msk.msra.mxu1 %vm1206_vm3, %v1105_v24 }
 0x129   : > { %5074 = vmatprep.subr.mxu1 %v5662_v16 }
 0x12b   : > { %5072 = vmatmul.mubr.msk.f32.vlgmr.msra.gmra.mrb[4].mxu1 %vm1206_vm3, %v1030_v26 }
 0x12c   : > { %5075 = vmatpush3.xpose.msk.msra.mxu1 %vm1206_vm3, %v1110_v27  ;;  %5076 = vmatprep.mubr.msk.f32.mxu1 %vm5663_vm2, %v5662_v16 }
 0x12d   : > { %5084 = vmatprep.subr.mxu1 %v5662_v16 }
 0x12f   : > { %5077 = vmatmul.mubr.msk.f32.vlgmr.msra.gmra.mrb[6].mxu1 %vm1206_vm3, %v1031_v28 }
 0x130   : > { %5086 = vmatprep.mubr.msk.f32.mxu1 %vm5663_vm2, %v5662_v16  ;;  %5085 = vmatpush3.msra.mxu1 %v1191_v57 }
 0x131   : > { %5419 = vmatprep.subr.bf16.mxu1 %v5418_v62 }
 0x1fe   : > { %v1279_v35 = vpop.f32.mrb[4].mxu1 }
 0x1ff   : > { %v5073_v36 = vpop.f32.mrb[5].mxu1  ;;  %v1280_v42 = vadd.f32 %v5925_v38, %v1279_v35  ;;  %v924_v35 = vld [vmem:[%s5812_s26 + $0x30] sm:$0xff] }
 0x200   : > { %v5426_v36 = vpack.c.bf16 %v923_v34, %v922_v33  ;;  %v909_v33 = vld [vmem:[%s6422_s5 + $0x58] sm:$0xff] }
 0x201   : > { %v1359_v44 = vsel %vm1206_vm3, %v1280_v42, -inf }
 0x202   : > { %v1355_v39 = vpop.f32.mrb[6].mxu1 }
 0x203   : > { %v1356_v40 = vadd.f32 %v5920_v37, %v1355_v39  ;;  %v5078_v41 = vpop.f32.mrb[7].mxu1  ;;  %v925_v39 = vld [vmem:[%s5812_s26 + $0x38] sm:$0xff] }
 0x205   : > { %v1362_v43 = vsel %vm1206_vm3, %v1356_v40, -inf }
 0x206   : > { %1363 = vmax.xlane.f32.xlu0 %v1362_v43 }
 0x20a   : > { %1360 = vmax.xlane.f32.xlu0 %v1359_v44 }
 0x293   : > { %v1364_v45 = vpop.xlane.xlu0 %1363 }
 0x294   : > { %v1366_v46 = vsub.f32 %v1356_v40, %v1364_v45  ;;  %v5430_v40 = vpack.c.bf16 %v925_v39, %v924_v35 }
 0x296   : > { %v1369_v47 = vmul.f32 1.442695, %v1366_v46 }
 0x297   : > { %v1361_v48 = vpop.xlane.xlu0 %1360 }
 0x298   : > { %5580 = vpow2.f32 %v1369_v47  ;;  %v1365_v49 = vsub.f32 %v1280_v42, %v1361_v48 }
 0x29a   : > { %v1367_v50 = vmul.f32 1.442695, %v1365_v49 }
 0x29c   : > { %5582 = vpow2.f32 %v1367_v50 }
 0x2a2   : > { %v5581_v51 = vpop.eup %5580 }
 0x2a3   : > { %v1374_v52 = vsel %vm1206_vm3, %v5581_v51, 0.0 }
 0x2a4   : > { %1375 = vadd.xlane.f32.xlu1 %v1374_v52 }
 0x2a6   : > { %v5583_v53 = vpop.eup %5582 }
 0x2a7   : > { %v1371_v54 = vsel %vm1206_vm3, %v5583_v53, 0.0 }
 0x2a8   : > { %1372 = vadd.xlane.f32.xlu1 %v1371_v54 }
 0x331   : > { %v1376_v2 = vpop.xlane.xlu1 %1375 }
 0x332   : > { %5584 = vrcp.f32 %v1376_v2 }
 0x335   : > { %v1373_v3 = vpop.xlane.xlu1 %1372 }
 0x336   : > { %5586 = vrcp.f32 %v1373_v3 }
 0x33c   : > { %v5585_v6 = vpop.eup %5584 }
 0x33d   : > { %v1380_v8 = vmul.f32 %v5585_v6, %v5581_v51  ;;  %v939_v6 = vld [vmem:[%s5827_s18 + $0x8] sm:$0xff] }
 0x33f   : > { %5087 = vmatmul.mubr.msk.f32.vlgmr.msra.gmra.mrb[8].mxu1 %vm1206_vm3, %v1380_v8  ;;  %v938_v8 = vld [vmem:[%s5827_s18] sm:$0xff] }
 0x340   : > { %v5587_v12 = vpop.eup %5586  ;;  %5421 = vmatpush3.bf16.msra.mxu1 %v5418_v62  ;;  %5108 = vmatprep.mubr.msk.f32.mxu1 %vm948_vm1, %v5875_v7 }
 0x341   : > { %v1379_v13 = vmul.f32 %v5587_v12, %v5583_v53  ;;  %5423 = vmatprep.subr.bf16.mxu1 %v5422_v9  ;;  %v888_v12 = vld [vmem:[%s6421_s28 + $0x50] sm:$0xff] }
 0x343   : > { %5082 = vmatmul.mubr.msk.f32.vlgmr.msra.gmra.mrb[2].mxu0 %vm1206_vm3, %v1379_v13  ;;  %v889_v13 = vld [vmem:[%s6421_s28 + $0x58] sm:$0xff] }
 0x344   : > { %5413 = vmatpush3.bf16.msra.mxu0 %v5410_v1  ;;  %5425 = vmatpush3.bf16.msra.mxu1 %v5422_v9  ;;  %v886_v9 = vld [vmem:[%s6421_s28 + $0x40] sm:$0xff] }
 0x345   : > { %5415 = vmatprep.subr.bf16.mxu0 %v5414_v15  ;;  %5097 = vmatprep.mubr.msk.f32.mxu0 %vm948_vm1, %v5875_v7  ;;  %v5434_v11 = vpack.c.bf16 %v887_v10, %v886_v9 }
 0x346   : > { %5122 = vmatprep.subr.mxu1 %v5662_v16 }
 0x347   : > { %5109 = vmatmul.mubr.msk.f32.vlgmr.msra.gmra.mrb[10].mxu1 %vm948_vm1, %v5885_v14 }
 0x348   : > { %5417 = vmatpush3.bf16.msra.mxu0 %v5414_v15  ;;  %5124 = vmatprep.mubr.msk.f32.mxu1 %vm5663_vm2, %v5662_v16  ;;  %v5438_v15 = vpack.c.bf16 %v889_v13, %v888_v12 }
 0x349   : > { %5427 = vmatprep.subr.bf16.mxu0 %v5426_v36 }
 0x34b   : > { %5098 = vmatmul.mubr.msk.f32.vlgmr.msra.gmra.mrb[4].mxu0 %vm948_vm1, %v5885_v14 }
 0x34c   : > { %5119 = vmatprep.mubr.msk.f32.mxu0 %vm948_vm1, %v5875_v7  ;;  %5429 = vmatpush3.bf16.msra.mxu0 %v5426_v36 }
 0x34d   : > { %5431 = vmatprep.subr.bf16.mxu0 %v5430_v40 }
 0x350   : > { %5433 = vmatpush3.bf16.msra.mxu0 %v5430_v40 }
 0x351   : > { %5132 = vmatprep.subr.mxu0 %v5662_v16 }
 0x353   : > { %5120 = vmatmul.mubr.msk.f32.vlgmr.msra.gmra.mrb[6].mxu0 %vm948_vm1, %v5885_v14 }
 0x354   : > { %5134 = vmatprep.mubr.msk.f32.mxu0 %vm5663_vm2, %v5662_v16 }
 0x412   : > { %v5957_v17 = vpop.f32.mrb[8].mxu1 }
 0x413   : > { %v5088_v18 = vpop.f32.mrb[9].mxu1 }
 0x414   : > { %v926_v18 = vld [vmem:[%s5812_s26 + $0x40] sm:$0xff] }
 0x416   : > { %v5959_v19 = vpop.f32.mrb[2].mxu0 }
 0x417   : > { %v5083_v20 = vpop.f32.mrb[3].mxu0 }
 0x418   : > { %v927_v20 = vld [vmem:[%s5812_s26 + $0x48] sm:$0xff] }
 0x41a   : > { %v5110_v22 = vpop.f32.mrb[10].mxu1 }
 0x41b   : > { %v1682_v23 = vpop.f32.mrb[11].mxu1  ;;  %v1688_v31 = vadd.f32 %v5110_v22, %v4755_v21  ;;  %v5450_v22 = vpack.c.bf16 %v927_v20, %v926_v18  ;;  %v911_v18 = vld [vmem:[%s6422_s5 + $0x68] sm:$0xff]  ;;  %v890_v20 = vld [vmem:[%s6421_s28 + $0x60] sm:$0xff] }
 0x41c   : > { %v1683_v24 = vadd.f32 %v4755_v21, %v1682_v23  ;;  %v928_v21 = vld [vmem:[%s5812_s26 + $0x50] sm:$0xff]  ;;  %v929_v23 = vld [vmem:[%s5812_s26 + $0x58] sm:$0xff] }
 0x41e   : > { %v5099_v26 = vpop.f32.mrb[4].mxu0  ;;  %5123 = vmatpush3.xpose.msk.msra.mxu1 %vm1206_vm3, %v1683_v24  ;;  %v5454_v24 = vpack.c.bf16 %v929_v23, %v928_v21 }
 0x41f   : > { %v1599_v27 = vpop.f32.mrb[5].mxu0  ;;  %5127 = vmatprep.subr.mxu1 %v5662_v16  ;;  %v1605_v29 = vadd.f32 %v5099_v26, %v4752_v25  ;;  %v906_v26 = vld [vmem:[%s6422_s5 + $0x40] sm:$0xff] }
 0x420   : > { %v1600_v28 = vadd.f32 %v4752_v25, %v1599_v27  ;;  %v907_v27 = vld [vmem:[%s6422_s5 + $0x48] sm:$0xff] }
 0x421   : > { %v1609_v32 = vmul.f32 0.35355338, %v1605_v29  ;;  %v5442_v29 = vpack.c.bf16 %v907_v27, %v906_v26  ;;  %v912_v27 = vld [vmem:[%s6422_s5 + $0x70] sm:$0xff] }
 0x422   : > { %v1608_v30 = vmul.f32 0.35355338, %v1600_v28 }
 0x424   : > { %5125 = vmatmul.mubr.msk.f32.vlgmr.msra.gmra.mrb[12].mxu1 %vm1206_vm3, %v1608_v30 }
 0x425   : > { %5128 = vmatpush3.xpose.msk.msra.mxu1 %vm1206_vm3, %v1688_v31  ;;  %5129 = vmatprep.mubr.msk.f32.mxu1 %vm5663_vm2, %v5662_v16 }
 0x426   : > { %5137 = vmatprep.subr.mxu1 %v5662_v16  ;;  %v5121_v59 = vpop.f32.mrb[6].mxu0 }
 0x427   : > { %v1763_v61 = vpop.f32.mrb[7].mxu0  ;;  %v1769_v63 = vadd.f32 %v5121_v59, %v4758_v60 }
 0x428   : > { %5130 = vmatmul.mubr.msk.f32.vlgmr.msra.gmra.mrb[14].mxu1 %vm1206_vm3, %v1609_v32  ;;  %v1764_v62 = vadd.f32 %v4758_v60, %v1763_v61  ;;  %v908_v32 = vld [vmem:[%s6422_s5 + $0x50] sm:$0xff] }
 0x429   : > { %5139 = vmatprep.mubr.msk.f32.mxu1 %vm5663_vm2, %v5662_v16  ;;  %5138 = vmatpush3.msra.mxu1 %v1769_v63  ;;  %v5446_v34 = vpack.c.bf16 %v909_v33, %v908_v32 }
 0x42a   : > { %5133 = vmatpush3.msra.mxu0 %v1764_v62  ;;  %5435 = vmatprep.subr.bf16.mxu1 %v5434_v11 }
 0x42b   : > { %5142 = vmatprep.subr.mxu0 %v939_v6 }
 0x4f7   : > { %v1844_v41 = vpop.f32.mrb[12].mxu1 }
 0x4f8   : > { %v1845_v42 = vadd.f32 %v5925_v38, %v1844_v41  ;;  %v5126_v43 = vpop.f32.mrb[13].mxu1  ;;  %v4774_v41 = vld [vmem:[%s5807_s22 + $0x2] ss:$0 sm:$0xff] }
 0x4fa   : > { %v1924_v44 = vsel %vm1206_vm3, %v1845_v42, -inf }
 0x4fb   : > { %1925 = vmax.xlane.f32.xlu0 %v1924_v44  ;;  %v1920_v45 = vpop.f32.mrb[14].mxu1  ;;  %v4777_v44 = vld [vmem:[%s5817_s29 + $0x2] ss:$0 sm:$0xff] }
 0x4fc   : > { %v1921_v46 = vadd.f32 %v5920_v37, %v1920_v45  ;;  %v5131_v47 = vpop.f32.mrb[15].mxu1 }
 0x4fe   : > { %v1927_v48 = vsel %vm1206_vm3, %v1921_v46, -inf }
 0x4ff   : > { %1928 = vmax.xlane.f32.xlu1 %v1927_v48 }
 0x588   : > { %v1926_v49 = vpop.xlane.xlu0 %1925 }
 0x589   : > { %v1930_v50 = vsub.f32 %v1845_v42, %v1926_v49 }
 0x58b   : > { %v1932_v51 = vmul.f32 1.442695, %v1930_v50 }
 0x58c   : > { %v1929_v52 = vpop.xlane.xlu1 %1928 }
 0x58d   : > { %5588 = vpow2.f32 %v1932_v51  ;;  %v1931_v53 = vsub.f32 %v1921_v46, %v1929_v52 }
 0x58f   : > { %v1934_v54 = vmul.f32 1.442695, %v1931_v53 }
 0x591   : > { %5590 = vpow2.f32 %v1934_v54 }
 0x597   : > { %v5589_v55 = vpop.eup %5588 }
 0x598   : > { %v1936_v56 = vsel %vm1206_vm3, %v5589_v55, 0.0 }
 0x599   : > { %1937 = vadd.xlane.f32.xlu0 %v1936_v56 }
 0x59b   : > { %v5591_v57 = vpop.eup %5590 }
 0x59c   : > { %v1939_v58 = vsel %vm1206_vm3, %v5591_v57, 0.0 }
 0x59d   : > { %1940 = vadd.xlane.f32.xlu1 %v1939_v58 }
 0x626   : > { %v1938_v0 = vpop.xlane.xlu0 %1937 }
 0x627   : > { %5592 = vrcp.f32 %v1938_v0 }
 0x62a   : > { %v1941_v1 = vpop.xlane.xlu1 %1940 }
 0x62b   : > { %5594 = vrcp.f32 %v1941_v1 }
 0x631   : > { %v5593_v2 = vpop.eup %5592 }
 0x632   : > { %v1944_v3 = vmul.f32 %v5593_v2, %v5589_v55 }
 0x634   : > { %5135 = vmatmul.mubr.msk.f32.vlgmr.msra.gmra.mrb[8].mxu0 %vm1206_vm3, %v1944_v3 }
 0x635   : > { %v5595_v4 = vpop.eup %5594  ;;  %5143 = vmatpush3.msra.mxu0 %v939_v6  ;;  %v940_v6 = vld [vmem:[%s5827_s18 + $0x10] sm:$0xff] }
 0x636   : > { %v1945_v5 = vmul.f32 %v5595_v4, %v5591_v57  ;;  %5147 = vmatprep.subr.mxu0 %v938_v8 }
 0x638   : > { %5140 = vmatmul.mubr.msk.f32.vlgmr.msra.gmra.mrb[16].mxu1 %vm1206_vm3, %v1945_v5 }
 0x639   : > { %5160 = vmatprep.mubr.msk.f32.mxu1 %vm948_vm1, %v5875_v7  ;;  %5437 = vmatpush3.bf16.msra.mxu1 %v5434_v11 }
 0x63a   : > { %5439 = vmatprep.subr.bf16.mxu1 %v5438_v15 }
 0x63d   : > { %5441 = vmatpush3.bf16.msra.mxu1 %v5438_v15  ;;  %v910_v15 = vld [vmem:[%s6422_s5 + $0x60] sm:$0xff] }
 0x63e   : > { %5451 = vmatprep.subr.bf16.mxu1 %v5450_v22  ;;  %v5466_v21 = vpack.c.bf16 %v911_v18, %v910_v15  ;;  %v941_v18 = vld [vmem:[%s5827_s18 + $0x18] sm:$0xff] }
 0x640   : > { %5161 = vmatmul.mubr.msk.f32.vlgmr.msra.gmra.mrb[18].mxu1 %vm948_vm1, %v5885_v14 }
 0x641   : > { %5182 = vmatprep.mubr.msk.f32.mxu1 %vm948_vm1, %v5875_v7  ;;  %5453 = vmatpush3.bf16.msra.mxu1 %v5450_v22  ;;  %v891_v22 = vld [vmem:[%s6421_s28 + $0x68] sm:$0xff] }
 0x642   : > { %5455 = vmatprep.subr.bf16.mxu1 %v5454_v24  ;;  %v5458_v23 = vpack.c.bf16 %v891_v22, %v890_v20 }
 0x645   : > { %5457 = vmatpush3.bf16.msra.mxu1 %v5454_v24  ;;  %v892_v24 = vld [vmem:[%s6421_s28 + $0x70] sm:$0xff] }
 0x646   : > { %5190 = vmatprep.subr.mxu1 %v5662_v16 }
 0x648   : > { %5183 = vmatmul.mubr.msk.f32.vlgmr.msra.gmra.mrb[20].mxu1 %vm948_vm1, %v5885_v14 }
 0x649   : > { %5192 = vmatprep.mubr.msk.f32.mxu1 %vm5663_vm2, %v5662_v16 }
 0x707   : > { %v2015_v25 = vpop.f32.mrb[8].mxu0 }
 0x708   : > { %v5136_v28 = vpop.f32.mrb[9].mxu0  ;;  %5144 = vmatprep.mubr.msk.f32.mxu0 %vm1206_vm3, %v2015_v25  ;;  %v893_v25 = vld [vmem:[%s6421_s28 + $0x78] sm:$0xff]  ;;  %s6427_s28 = scalar_lea.vmem %s6375_s11, %s5785_s23 }
 0x709   : > { %v5462_v26 = vpack.c.bf16 %v893_v25, %v892_v24  ;;  %v913_v28 = vld [vmem:[%s6422_s5 + $0x78] sm:$0xff] }
 0x70a   : > { %v5470_v32 = vpack.c.bf16 %v913_v28, %v912_v27 }
 0x70b   : > { %v2088_v30 = vpop.f32.mrb[16].mxu1 }
 0x70c   : > { %v5141_v31 = vpop.f32.mrb[17].mxu1  ;;  %5145 = vmatmul.mubr.msk.f32.vlgmr.msra.gmra.mrb[10].mxu0 %vm1206_vm3, %v2088_v30 }
 0x70d   : > { %5148 = vmatpush3.msra.mxu0 %v938_v8  ;;  %5149 = vmatprep.mubr.msk.f32.mxu0 %vm1206_vm3, %v5959_v19 }
 0x70e   : > { %5443 = vmatprep.subr.bf16.mxu0 %v5442_v29 }
 0x713   : > { %v5162_v19 = vpop.f32.mrb[18].mxu1 }
 0x714   : > { %5150 = vmatmul.mubr.msk.f32.vlgmr.msra.gmra.mrb[10].mxu0 %vm1206_vm3, %v5957_v17  ;;  %v2326_v35 = vpop.f32.mrb[19].mxu1  ;;  %v4771_v17 = vld [vmem:[%s6423_s1 + $0x2] ss:$0 sm:$0xff] }
 0x715   : > { %5445 = vmatpush3.bf16.msra.mxu0 %v5442_v29  ;;  %5171 = vmatprep.mubr.msk.f32.mxu0 %vm948_vm1, %v5875_v7  ;;  %v2332_v40 = vadd.f32 %v5162_v19, %v4771_v17  ;;  %v2327_v42 = vadd.f32 %v4771_v17, %v2326_v35  ;;  %v4788_v35 = vld [vmem:[%s6423_s1 + $0x3] ss:$0 sm:$0xff] }
 0x716   : > { %5447 = vmatprep.subr.bf16.mxu0 %v5446_v34 }
 0x717   : > { %v2336_v47 = vmul.f32 0.35355338, %v2332_v40  ;;  %v2335_v49 = vmul.f32 0.35355338, %v2327_v42 }
 0x719   : > { %5449 = vmatpush3.bf16.msra.mxu0 %v5446_v34 }
 0x71a   : > { %5185 = vmatprep.subr.mxu0 %v5662_v16 }
 0x71b   : > { %v5184_v36 = vpop.f32.mrb[20].mxu1 }
 0x71c   : > { %5172 = vmatmul.mubr.msk.f32.vlgmr.msra.gmra.mrb[12].mxu0 %vm948_vm1, %v5885_v14  ;;  %v2490_v39 = vpop.f32.mrb[21].mxu1  ;;  %v2496_v50 = vadd.f32 %v5184_v36, %v4777_v44  ;;  %v4791_v36 = vld [vmem:[%s5807_s22 + $0x3] ss:$0 sm:$0xff] }
 0x71d   : > { %5187 = vmatprep.mubr.msk.f32.mxu0 %vm5663_vm2, %v5662_v16  ;;  %v2491_v51 = vadd.f32 %v4777_v44, %v2490_v39 }
 0x7ef   : > { %v5173_v43 = vpop.f32.mrb[12].mxu0 }
 0x7f0   : > { %v2415_v45 = vadd.f32 %v5173_v43, %v4774_v41  ;;  %v2409_v46 = vpop.f32.mrb[13].mxu0 }
 0x7f1   : > { %v2410_v48 = vadd.f32 %v4774_v41, %v2409_v46  ;;  %v930_v46 = vld [vmem:[%s5812_s26 + $0x60] sm:$0xff] }
 0x7f2   : > { %5191 = vmatpush3.xpose.msk.msra.mxu1 %vm1206_vm3, %v2415_v45 }
 0x7f3   : > { %5186 = vmatpush3.xpose.msk.msra.mxu0 %vm1206_vm3, %v2410_v48  ;;  %5200 = vmatprep.subr.mxu1 %v5662_v16  ;;  %v932_v48 = vld [vmem:[%s5812_s26 + $0x70] sm:$0xff] }
 0x7f4   : > { %5195 = vmatprep.subr.mxu0 %v5662_v16 }
 0x7f5   : > { %5193 = vmatmul.mubr.msk.f32.vlgmr.msra.gmra.mrb[22].mxu1 %vm1206_vm3, %v2336_v47  ;;  %v931_v47 = vld [vmem:[%s5812_s26 + $0x68] sm:$0xff] }
 0x7f6   : > { %5188 = vmatmul.mubr.msk.f32.vlgmr.msra.gmra.mrb[14].mxu0 %vm1206_vm3, %v2335_v49  ;;  %5201 = vmatpush3.msra.mxu1 %v2496_v50  ;;  %v5474_v49 = vpack.c.bf16 %v931_v47, %v930_v46  ;;  %v933_v50 = vld [vmem:[%s5812_s26 + $0x78] sm:$0xff]  ;;  %v3700_v47 = vld [vmem:[%s5850_s8] sm:$0xff] }
 0x7f7   : > { %5196 = vmatpush3.msra.mxu0 %v2491_v51  ;;  %5202 = vmatprep.mubr.msk.f32.mxu1 %vm5663_vm2, %v5662_v16  ;;  %v5478_v51 = vpack.c.bf16 %v933_v50, %v932_v48  ;;  %v3701_v48 = vld [vmem:[%s5850_s8 + $0x8] sm:$0xff] }
 0x7f8   : > { %5197 = vmatprep.mubr.msk.f32.mxu0 %vm5663_vm2, %v5662_v16  ;;  %5205 = vmatprep.subr.mxu0 %v940_v6  ;;  %v5490_v50 = vpack.c.bf16 %v3701_v48, %v3700_v47  ;;  %v4815_v47 = vld [vmem:[%s864_s24] ss:$0 sm:$0xff] }
 0x7f9   : > { %5459 = vmatprep.subr.bf16.mxu1 %v5458_v23 }
 0x8c8   : > { %v2647_v52 = vpop.f32.mrb[22].mxu1 }
 0x8c9   : > { %v2648_v53 = vadd.f32 %v5920_v37, %v2647_v52  ;;  %v2571_v54 = vpop.f32.mrb[14].mxu0  ;;  %v5194_v55 = vpop.f32.mrb[23].mxu1 }
 0x8ca   : > { %v2572_v56 = vadd.f32 %v5925_v38, %v2571_v54  ;;  %v5189_v57 = vpop.f32.mrb[15].mxu0 }
 0x8cb   : > { %v2654_v58 = vsel %vm1206_vm3, %v2648_v53, -inf }
 0x8cc   : > { %2655 = vmax.xlane.f32.xlu1 %v2654_v58  ;;  %v2651_v59 = vsel %vm1206_vm3, %v2572_v56, -inf }
 0x8cd   : > { %2652 = vmax.xlane.f32.xlu0 %v2651_v59 }
 0x959   : > { %v2656_v60 = vpop.xlane.xlu1 %2655 }
 0x95a   : > { %v2658_v61 = vsub.f32 %v2648_v53, %v2656_v60  ;;  %v2653_v62 = vpop.xlane.xlu0 %2652 }
 0x95b   : > { %v2657_v63 = vsub.f32 %v2572_v56, %v2653_v62 }
 0x95c   : > { %v2661_v0 = vmul.f32 1.442695, %v2658_v61 }
 0x95d   : > { %v2659_v1 = vmul.f32 1.442695, %v2657_v63 }
 0x95e   : > { %5596 = vpow2.f32 %v2661_v0 }
 0x95f   : > { %5598 = vpow2.f32 %v2659_v1 }
 0x968   : > { %v5597_v2 = vpop.eup %5596 }
 0x969   : > { %v5599_v3 = vpop.eup %5598  ;;  %v2666_v4 = vsel %vm1206_vm3, %v5597_v2, 0.0 }
 0x96a   : > { %2667 = vadd.xlane.f32.xlu1 %v2666_v4  ;;  %v2663_v5 = vsel %vm1206_vm3, %v5599_v3, 0.0  ;;  %v4794_v4 = vld [vmem:[%s5817_s29 + $0x3] ss:$0 sm:$0xff]  ;;  %s6425_s29 = scalar_lea.vmem %s6373_s9, %s5785_s23 }
 0x96b   : > { %2664 = vadd.xlane.f32.xlu0 %v2663_v5  ;;  %v4805_v24 = vld [vmem:[%s6425_s29] ss:$0 sm:$0xff] }
 0x9f7   : > { %v2668_v8 = vpop.xlane.xlu1 %2667 }
 0x9f8   : > { %5600 = vrcp.f32 %v2668_v8  ;;  %v2665_v9 = vpop.xlane.xlu0 %2664 }
 0x9f9   : > { %5602 = vrcp.f32 %v2665_v9 }
 0xa02   : > { %v5601_v10 = vpop.eup %5600 }
 0xa03   : > { %v5603_v11 = vpop.eup %5602  ;;  %v2672_v12 = vmul.f32 %v5601_v10, %v5597_v2 }
 0xa04   : > { %v2671_v13 = vmul.f32 %v5603_v11, %v5599_v3 }
 0xa05   : > { %5203 = vmatmul.mubr.msk.f32.vlgmr.msra.gmra.mrb[24].mxu1 %vm1206_vm3, %v2672_v12 }
 0xa06   : > { %5198 = vmatmul.mubr.msk.f32.vlgmr.msra.gmra.mrb[16].mxu0 %vm1206_vm3, %v2671_v13  ;;  %5218 = vmatprep.mubr.msk.f32.mxu1 %vm948_vm1, %v5875_v7 }
 0xa07   : > { %5206 = vmatpush3.msra.mxu0 %v940_v6  ;;  %5461 = vmatpush3.bf16.msra.mxu1 %v5458_v23 }
 0xa08   : > { %5467 = vmatprep.subr.bf16.mxu0 %v5466_v21  ;;  %5463 = vmatprep.subr.bf16.mxu1 %v5462_v26 }
 0xa0b   : > { %5465 = vmatpush3.bf16.msra.mxu1 %v5462_v26 }
 0xa0c   : > { %5475 = vmatprep.subr.bf16.mxu1 %v5474_v49 }
 0xa0e   : > { %5219 = vmatmul.mubr.msk.f32.vlgmr.msra.gmra.mrb[26].mxu1 %vm948_vm1, %v5885_v14 }
 0xa0f   : > { %5240 = vmatprep.mubr.msk.f32.mxu1 %vm948_vm1, %v5875_v7  ;;  %5477 = vmatpush3.bf16.msra.mxu1 %v5474_v49  ;;  %v3702_v49 = vld [vmem:[%s5850_s8 + $0x10] sm:$0xff] }
 0xa10   : > { %5479 = vmatprep.subr.bf16.mxu1 %v5478_v51 }
 0xa13   : > { %5481 = vmatpush3.bf16.msra.mxu1 %v5478_v51  ;;  %v3703_v51 = vld [vmem:[%s5850_s8 + $0x18] sm:$0xff] }
 0xa14   : > { %5253 = vmatprep.subr.mxu1 %v5662_v16 }
 0xa16   : > { %5241 = vmatmul.mubr.msk.f32.vlgmr.msra.gmra.mrb[28].mxu1 %vm948_vm1, %v5885_v14 }
 0xa17   : > { %5255 = vmatprep.mubr.msk.f32.mxu1 %vm5663_vm2, %v5662_v16 }
 0xad8   : > { %v2815_v29 = vpop.f32.mrb[24].mxu1 }
 0xad9   : > { %v2742_v30 = vpop.f32.mrb[16].mxu0  ;;  %v5204_v31 = vpop.f32.mrb[25].mxu1 }
 0xada   : > { %v5199_v33 = vpop.f32.mrb[17].mxu0  ;;  %5207 = vmatprep.mubr.msk.f32.mxu0 %vm1206_vm3, %v2742_v30 }
 0xadb   : > { %5208 = vmatmul.mubr.msk.f32.vlgmr.msra.gmra.mrb[10].mxu0 %vm1206_vm3, %v2815_v29 }
 0xadc   : > { %5469 = vmatpush3.bf16.msra.mxu0 %v5466_v21  ;;  %5229 = vmatprep.mubr.msk.f32.mxu0 %vm948_vm1, %v5875_v7 }
 0xadd   : > { %5471 = vmatprep.subr.bf16.mxu0 %v5470_v32 }
 0xae0   : > { %5473 = vmatpush3.bf16.msra.mxu0 %v5470_v32 }
 0xae1   : > { %5243 = vmatprep.subr.mxu0 %v5662_v16  ;;  %v5220_v34 = vpop.f32.mrb[26].mxu1 }
 0xae2   : > { %v2974_v19 = vpop.f32.mrb[27].mxu1  ;;  %v2980_v43 = vadd.f32 %v5220_v34, %v4788_v35 }
 0xae3   : > { %5230 = vmatmul.mubr.msk.f32.vlgmr.msra.gmra.mrb[18].mxu0 %vm948_vm1, %v5885_v14  ;;  %v2975_v39 = vadd.f32 %v4788_v35, %v2974_v19 }
 0xae4   : > { %5245 = vmatprep.mubr.msk.f32.mxu0 %vm5663_vm2, %v5662_v16  ;;  %v2984_v45 = vmul.f32 0.35355338, %v2980_v43 }
 0xae5   : > { %v2983_v42 = vmul.f32 0.35355338, %v2975_v39 }
 0xae9   : > { %v5242_v3 = vpop.f32.mrb[28].mxu1 }
 0xaea   : > { %v3138_v5 = vpop.f32.mrb[29].mxu1  ;;  %v3144_v8 = vadd.f32 %v5242_v3, %v4794_v4 }
 0xaeb   : > { %v3139_v6 = vadd.f32 %v4794_v4, %v3138_v5  ;;  %v3706_v5 = vld [vmem:[%s5850_s8 + $0x30] sm:$0xff] }
 0xaed   : > { %5254 = vmatpush3.msra.mxu1 %v3139_v6  ;;  %v3707_v6 = vld [vmem:[%s5850_s8 + $0x38] sm:$0xff] }
 0xbb6   : > { %v5231_v17 = vpop.f32.mrb[18].mxu0 }
 0xbb7   : > { %v3057_v40 = vpop.f32.mrb[19].mxu0  ;;  %v3063_v44 = vadd.f32 %v5231_v17, %v4791_v36 }
 0xbb8   : > { %v3058_v41 = vadd.f32 %v4791_v36, %v3057_v40 }
 0xbba   : > { %5244 = vmatpush3.xpose.msk.msra.mxu0 %vm1206_vm3, %v3058_v41  ;;  %v3606_v41 = vld [vmem:[%s5840_s6] sm:$0xff] }
 0xbbb   : > { %5248 = vmatprep.subr.mxu0 %v5662_v16 }
 0xbbd   : > { %5246 = vmatmul.mubr.msk.f32.vlgmr.msra.gmra.mrb[20].mxu0 %vm1206_vm3, %v2983_v42  ;;  %v3607_v42 = vld [vmem:[%s5840_s6 + $0x8] sm:$0xff] }
 0xbbe   : > { %5249 = vmatpush3.xpose.msk.msra.mxu0 %vm1206_vm3, %v3063_v44  ;;  %5250 = vmatprep.mubr.msk.f32.mxu0 %vm5663_vm2, %v5662_v16  ;;  %v5482_v43 = vpack.c.bf16 %v3607_v42, %v3606_v41  ;;  %v3608_v44 = vld [vmem:[%s5840_s6 + $0x10] sm:$0xff] }
 0xbbf   : > { %5258 = vmatprep.subr.mxu0 %v5662_v16 }
 0xbc0   : > { %5483 = vmatprep.subr.bf16.mxu1 %v5482_v43 }
 0xbc1   : > { %5251 = vmatmul.mubr.msk.f32.vlgmr.msra.gmra.mrb[22].mxu0 %vm1206_vm3, %v2984_v45  ;;  %v3609_v45 = vld [vmem:[%s5840_s6 + $0x18] sm:$0xff] }
 0xbc2   : > { %5260 = vmatprep.mubr.msk.f32.mxu0 %vm5663_vm2, %v5662_v16  ;;  %5259 = vmatpush3.msra.mxu0 %v3144_v8  ;;  %v5486_v46 = vpack.c.bf16 %v3609_v45, %v3608_v44  ;;  %v5502_v8 = vpack.c.bf16 %v3707_v6, %v3706_v5  ;;  %v4814_v44 = vld [vmem:[%s861_s2] ss:$0 sm:$0xff]  ;;  %s6429_s2 = sld [smem:[#allocation7_spill]] }
 0xbc3   : > { %5263 = vmatprep.subr.mxu0 %v941_v18 }
 0xbc8   : > { %p4816_p5 = scmp.ne.s32.totalorder %s6429_s2, 1 }
 0xbc9   : > { %s6430_s23 = sld [smem:[#allocation20_spill]] (!%p4816_p5)  ;;  %vm5665_vm5 = vmmov (!%p4816_p5), 0   ;;  %vm3861_vm6 = vcmask (!%p4816_p5), 1041409   ;;  %s6431_s5 = sld [smem:[#allocation21_spill]] (!%p4816_p5)  ;;  %vm4508_vm7 = vcmask (!%p4816_p5), 123904  }
 0xbcf   : > { %v4829_v5 = vld [vmem:[%s6430_s23 + $0x68] sm:$0xff] (!%p4816_p5) }
 0xc90   : > { %v3219_v52 = vpop.f32.mrb[20].mxu0 }
 0xc91   : > { %v3220_v53 = vadd.f32 %v5925_v38, %v3219_v52  ;;  %v5247_v54 = vpop.f32.mrb[21].mxu0  ;;  %v5494_v52 = vpack.c.bf16 %v3703_v51, %v3702_v49 }
 0xc92   : > { %v3705_v54 = vld [vmem:[%s5850_s8 + $0x28] sm:$0xff] }
 0xc93   : > { %v3299_v55 = vsel %vm1206_vm3, %v3220_v53, -inf }
 0xc94   : > { %3300 = vmax.xlane.f32.xlu0 %v3299_v55  ;;  %v3295_v56 = vpop.f32.mrb[22].mxu0 }
 0xc95   : > { %v3296_v57 = vadd.f32 %v5920_v37, %v3295_v56  ;;  %v5252_v58 = vpop.f32.mrb[23].mxu0 }
 0xc97   : > { %v3302_v59 = vsel %vm1206_vm3, %v3296_v57, -inf }
 0xc98   : > { %3303 = vmax.xlane.f32.xlu1 %v3302_v59 }
 0xd21   : > { %v3301_v60 = vpop.xlane.xlu0 %3300 }
 0xd22   : > { %v3305_v61 = vsub.f32 %v3220_v53, %v3301_v60  ;;  %v3704_v53 = vld [vmem:[%s5850_s8 + $0x20] sm:$0xff] }
 0xd23   : > { %v5498_v55 = vpack.c.bf16 %v3705_v54, %v3704_v53  ;;  %v4817_v53 = vld [vmem:[%s6430_s23 + $0x20] sm:$0xff] (!%p4816_p5)  ;;  %v4818_v54 = vld [vmem:[%s6430_s23 + $0x28] sm:$0xff] (!%p4816_p5) }
 0xd24   : > { %v3307_v62 = vmul.f32 1.442695, %v3305_v61 }
 0xd25   : > { %v3304_v63 = vpop.xlane.xlu1 %3303 }
 0xd26   : > { %5604 = vpow2.f32 %v3307_v62  ;;  %v3306_v16 = vsub.f32 %v3296_v57, %v3304_v63  ;;  %v4806_v63 = vld [vmem:[%s6426_s21] ss:$0 sm:$0xff] }
 0xd28   : > { %v3309_v0 = vmul.f32 1.442695, %v3306_v16 }
 0xd2a   : > { %5606 = vpow2.f32 %v3309_v0 }
 0xd30   : > { %v5605_v38 = vpop.eup %5604 }
 0xd31   : > { %v3311_v1 = vsel %vm1206_vm3, %v5605_v38, 0.0 }
 0xd32   : > { %3312 = vadd.xlane.f32.xlu0 %v3311_v1  ;;  %v4807_v1 = vld [vmem:[%s6427_s28] ss:$0 sm:$0xff] }
 0xd34   : > { %v5607_v2 = vpop.eup %5606 }
 0xd35   : > { %v3314_v37 = vsel %vm1206_vm3, %v5607_v2, 0.0 }
 0xd36   : > { %3315 = vadd.xlane.f32.xlu1 %v3314_v37 }
 0xdbf   : > { %v3313_v9 = vpop.xlane.xlu0 %3312 }
 0xdc0   : > { %5608 = vrcp.f32 %v3313_v9  ;;  %v4808_v9 = vld [vmem:[%s6428_s19] ss:$0 sm:$0xff] }
 0xdc3   : > { %v3316_v10 = vpop.xlane.xlu1 %3315 }
 0xdc4   : > { %5610 = vrcp.f32 %v3316_v10 }
 0xdca   : > { %v5609_v11 = vpop.eup %5608 }
 0xdcb   : > { %v3319_v12 = vmul.f32 %v5609_v11, %v5605_v38 }
 0xdcd   : > { %5256 = vmatmul.mubr.msk.f32.vlgmr.msra.gmra.mrb[30].mxu1 %vm1206_vm3, %v3319_v12 }
 0xdce   : > { %v5611_v13 = vpop.eup %5610  ;;  %5485 = vmatpush3.bf16.msra.mxu1 %v5482_v43 }
 0xdcf   : > { %v3320_v15 = vmul.f32 %v5611_v13, %v5607_v2  ;;  %5487 = vmatprep.subr.bf16.mxu1 %v5486_v46 }
 0xdd1   : > { %5261 = vmatmul.mubr.msk.f32.vlgmr.msra.gmra.mrb[24].mxu0 %vm1206_vm3, %v3320_v15 }
 0xdd2   : > { %5264 = vmatpush3.msra.mxu0 %v941_v18  ;;  %5489 = vmatpush3.bf16.msra.mxu1 %v5486_v46 }
 0xdd3   : > { %5491 = vmatprep.subr.bf16.mxu0 %v5490_v50 }
 0xea0   : > { %v3390_v20 = vpop.f32.mrb[30].mxu1 }
 0xea1   : > { %v5257_v21 = vpop.f32.mrb[31].mxu1  ;;  %5265 = vmatprep.mubr.msk.f32.mxu0 %vm1206_vm3, %v3390_v20  ;;  %v4811_v20 = vld [vmem:[%s858_s25] ss:$0 sm:$0xff] }
 0xea4   : > { %v3463_v22 = vpop.f32.mrb[24].mxu0 }
 0xea5   : > { %v5262_v23 = vpop.f32.mrb[25].mxu0  ;;  %5266 = vmatmul.mubr.msk.f32.vlgmr.msra.gmra.mrb[10].mxu0 %vm1206_vm3, %v3463_v22 }
 0xea6   : > { %5493 = vmatpush3.bf16.msra.mxu0 %v5490_v50 }
 0xea7   : > { %5495 = vmatprep.subr.bf16.mxu0 %v5494_v52 }
 0xeaa   : > { %5497 = vmatpush3.bf16.msra.mxu0 %v5494_v52 }
 0xeab   : > { %5499 = vmatprep.subr.bf16.mxu0 %v5498_v55 }
 0xeae   : > { %5501 = vmatpush3.bf16.msra.mxu0 %v5498_v55  ;;  %v3849_v55 = vld [vmem:[%s6430_s23] sm:$0xff] (!%p4816_p5) }
 0xeaf   : > { %5503 = vmatprep.subr.bf16.mxu0 %v5502_v8 }
 0xeb2   : > { %5505 = vmatpush3.bf16.msra.mxu0 %v5502_v8 }
 0xf78   : > { %v5267_v25 = vpop.f32.mrb[10].mxu0 }
 0xf79   : > { %v3558_v26 = vadd.f32 %v5267_v25, %v4805_v24  ;;  %v3539_v27 = vpop.f32.mrb[11].mxu0 }
 0xf7a   : > { %v3557_v28 = vadd.f32 %v4805_v24, %v3539_v27 }
 0xf7b   : > { %v3560_v29 = vadd.f32 %v3558_v26, %v5885_v14 }
 0xf7c   : > { %v3559_v30 = vadd.f32 %v3557_v28, %v5875_v7 }
 0xf7d   : > { %v3566_v31 = vsel %vm948_vm1, %v3560_v29, 0.0 }
 0xf7e   : > { %3567 = vadd.xlane.f32.xlu1 %v3566_v31  ;;  %v3563_v32 = vsel %vm948_vm1, %v3559_v30, 0.0 }
 0xf7f   : > { %3564 = vadd.xlane.f32.xlu0 %v3563_v32 }
0x100b   : > { %v3568_v33 = vpop.xlane.xlu1 %3567 }
0x100c   : > { %v3571_v34 = vmul.f32 0.03125, %v3568_v33  ;;  %v3565_v19 = vpop.xlane.xlu0 %3564 }
0x100d   : > { %v3570_v35 = vmul.f32 0.03125, %v3565_v19 }
0x100e   : > { %v3573_v36 = vsub.f32 %v3560_v29, %v3571_v34 }
0x100f   : > { %v3572_v39 = vsub.f32 %v3559_v30, %v3570_v35 }
0x1010   : > { %v3575_v17 = vmul.f32 %v3573_v36, %v3573_v36 }
0x1011   : > { %v3574_v14 = vmul.f32 %v3572_v39, %v3572_v39 }
0x1012   : > { %v3579_v7 = vsel %vm948_vm1, %v3575_v17, 0.0 }
0x1013   : > { %3580 = vadd.xlane.f32.xlu1 %v3579_v7  ;;  %v3576_v40 = vsel %vm948_vm1, %v3574_v14, 0.0 }
0x1014   : > { %3577 = vadd.xlane.f32.xlu0 %v3576_v40 }
0x10a0   : > { %v3581_v56 = vpop.xlane.xlu1 %3580 }
0x10a1   : > { %v3583_v57 = vmul.f32 0.03125, %v3581_v56  ;;  %v3578_v58 = vpop.xlane.xlu0 %3577  ;;  %v5664_v56 = vmov (!%p4816_p5), 0.0|0.0  }
0x10a2   : > { %v3582_v59 = vmul.f32 0.03125, %v3578_v58  ;;  %5506 = vmatprep.subr.bf16.mxu0 (!%p4816_p5), %v5664_v56  ;;  %5512 = vmatprep.subr.bf16.mxu1 (!%p4816_p5), %v5664_v56  ;;  %v3850_v58 = vld [vmem:[%s6430_s23 + $0x8] sm:$0xff] (!%p4816_p5) }
0x10a3   : > { %v3585_v60 = vadd.f32 1e-05, %v3583_v57  ;;  %v5507_v57 = vpack.c.bf16 (!%p4816_p5), %v4818_v54, %v4817_v53  ;;  %v4850_v53 = vld [vmem:[%s6430_s23 + $0xf0] sm:$0xff] (!%p4816_p5)  ;;  %v4851_v54 = vld [vmem:[%s6430_s23 + $0xf8] sm:$0xff] (!%p4816_p5) }
0x10a4   : > { %v3584_v61 = vadd.f32 1e-05, %v3582_v59  ;;  %v4819_v59 = vld [vmem:[%s6430_s23 + $0x30] sm:$0xff] (!%p4816_p5) }
0x10a5   : > { %5612 = vrsqrt.f32 %v3585_v60  ;;  %v4820_v60 = vld [vmem:[%s6430_s23 + $0x38] sm:$0xff] (!%p4816_p5) }
0x10a6   : > { %5614 = vrsqrt.f32 %v3584_v61  ;;  %v5513_v61 = vpack.c.bf16 (!%p4816_p5), %v3850_v58, %v3849_v55 }
0x10af   : > { %v5613_v62 = vpop.eup %5612 }
0x10b0   : > { %v5615_v16 = vpop.eup %5614  ;;  %v3589_v0 = vmul.f32 %v5613_v62, %v3573_v36  ;;  %v3851_v62 = vld [vmem:[%s6430_s23 + $0x10] sm:$0xff] (!%p4816_p5) }
0x10b1   : > { %v3588_v38 = vmul.f32 %v5615_v16, %v3572_v39  ;;  %v5666_v16 = vmov (!%p4816_p5), 0.0  }
0x10b2   : > { %v3597_v2 = vmul.f32 %v4806_v63, %v3589_v0  ;;  %v5510_v0 = vpack.c.bf16 (!%p4816_p5), %v4820_v60, %v4819_v59  ;;  %v5552_v59 = vpack.c.bf16 (!%p4816_p5), %v4851_v54, %v4850_v53 }
0x10b3   : > { %v3596_v37 = vmul.f32 %v4806_v63, %v3588_v38  ;;  %v3852_v63 = vld [vmem:[%s6430_s23 + $0x18] sm:$0xff] (!%p4816_p5) }
0x10b4   : > { %v3605_v4 = vadd.f32 %v4807_v1, %v3597_v2 }
0x10b5   : > { %v3604_v3 = vadd.f32 %v4807_v1, %v3596_v37  ;;  %v5516_v1 = vpack.c.bf16 (!%p4816_p5), %v3852_v63, %v3851_v62  ;;  %v4823_v37 = vld [vmem:[%s6430_s23 + $0x40] sm:$0xff] (!%p4816_p5) }
0x10b7   : > { %5276 = vmatprep.mubr.msk.f32.mxu1 %vm948_vm1, %v3604_v3 }
0x10b8   : > { %5277 = vmatmul.mubr.msk.f32.vlgmr.msra.gmra.mrb[32].mxu1 %vm948_vm1, %v3605_v4 }
0x10b9   : > { %5317 = vmatprep.mubr.msk.f32.mxu1 (!%p4816_p5), %vm5665_vm5, %v5666_v16  ;;  %5514 = vmatpush3.bf16.msra.mxu1 (!%p4816_p5), %v5513_v61 }
0x10ba   : > { %5515 = vmatprep.subr.bf16.mxu1 (!%p4816_p5), %v5664_v56 }
0x10bd   : > { %5517 = vmatpush3.bf16.msra.mxu1 (!%p4816_p5), %v5516_v1 }
0x10be   : > { %5524 = vmatprep.subr.bf16.mxu1 (!%p4816_p5), %v5664_v56 }
0x118b   : > { %v5278_v10 = vpop.f32.mrb[32].mxu1 }
0x118c   : > { %v3695_v11 = vadd.f32 %v5278_v10, %v4808_v9  ;;  %v3689_v12 = vpop.f32.mrb[33].mxu1 }
0x118d   : > { %v3690_v13 = vadd.f32 %v4808_v9, %v3689_v12  ;;  %v4826_v12 = vld [vmem:[%s6430_s23 + $0x58] sm:$0xff] (!%p4816_p5) }
0x118e   : > { %v3699_v18 = vmax.f32 %v3695_v11, 0.0  ;;  %v4825_v11 = vld [vmem:[%s6430_s23 + $0x50] sm:$0xff] (!%p4816_p5) }
0x118f   : > { %v3698_v15 = vmax.f32 %v3690_v13, 0.0  ;;  %v4830_v13 = vld [vmem:[%s6430_s23 + $0x70] sm:$0xff] (!%p4816_p5) }
0x1191   : > { %5295 = vmatprep.mubr.msk.f32.mxu0 %vm3715_vm4, %v3698_v15  ;;  %v4831_v15 = vld [vmem:[%s6430_s23 + $0x78] sm:$0xff] (!%p4816_p5) }
0x1192   : > { %5296 = vmatmul.mubr.msk.f32.vlgmr.msra.gmra.mrb[26].mxu0 %vm3715_vm4, %v3699_v18  ;;  %v5522_v18 = vpack.c.bf16 (!%p4816_p5), %v4826_v12, %v4825_v11 }
0x1193   : > { %5306 = vmatprep.mubr.msk.f32.mxu0 (!%p4816_p5), %vm5665_vm5, %v5666_v16  ;;  %5508 = vmatpush3.bf16.msra.mxu0 (!%p4816_p5), %v5507_v57 }
0x1194   : > { %5509 = vmatprep.subr.bf16.mxu0 (!%p4816_p5), %v5664_v56 }
0x1197   : > { %5511 = vmatpush3.bf16.msra.mxu0 (!%p4816_p5), %v5510_v0 }
0x1198   : > { %5518 = vmatprep.subr.bf16.mxu0 (!%p4816_p5), %v5664_v56 }
0x1265   : > { %v5297_v21 = vpop.f32.mrb[26].mxu0 }
0x1266   : > { %v3794_v22 = vadd.f32 %v5297_v21, %v4811_v20  ;;  %v3788_v23 = vpop.f32.mrb[27].mxu0 }
0x1267   : > { %v3789_v24 = vadd.f32 %v4811_v20, %v3788_v23  ;;  %v4833_v23 = vld [vmem:[%s6430_s23 + $0x80] sm:$0xff] (!%p4816_p5) }
0x1268   : > { %v3798_v25 = vadd.f32 %v3794_v22, %v3605_v4  ;;  %v4828_v4 = vld [vmem:[%s6430_s23 + $0x60] sm:$0xff] (!%p4816_p5)  ;;  %v5528_v22 = vpack.c.bf16 (!%p4816_p5), %v4831_v15, %v4830_v13 }
0x1269   : > { %v3797_v26 = vadd.f32 %v3789_v24, %v3604_v3  ;;  %v4824_v3 = vld [vmem:[%s6430_s23 + $0x48] sm:$0xff] (!%p4816_p5)  ;;  %v5525_v10 = vpack.c.bf16 (!%p4816_p5), %v4829_v5, %v4828_v4 }
0x126a   : > { %v3804_v27 = vsel %vm948_vm1, %v3798_v25, 0.0  ;;  %v5519_v8 = vpack.c.bf16 (!%p4816_p5), %v4824_v3, %v4823_v37  ;;  %v4834_v24 = vld [vmem:[%s6430_s23 + $0x88] sm:$0xff] (!%p4816_p5) }
0x126b   : > { %3805 = vadd.xlane.f32.xlu1 %v3804_v27  ;;  %v3801_v28 = vsel %vm948_vm1, %v3797_v26, 0.0  ;;  %v4838_v27 = vld [vmem:[%s6430_s23 + $0xa0] sm:$0xff] (!%p4816_p5) }
0x126c   : > { %3802 = vadd.xlane.f32.xlu0 %v3801_v28  ;;  %v4839_v28 = vld [vmem:[%s6430_s23 + $0xa8] sm:$0xff] (!%p4816_p5) }
0x12f8   : > { %v3806_v29 = vpop.xlane.xlu1 %3805 }
0x12f9   : > { %v3808_v30 = vmul.f32 0.03125, %v3806_v29  ;;  %v3803_v31 = vpop.xlane.xlu0 %3802 }
0x12fa   : > { %v3807_v32 = vmul.f32 0.03125, %v3803_v31 }
0x12fb   : > { %v3810_v33 = vsub.f32 %v3798_v25, %v3808_v30  ;;  %v5531_v30 = vpack.c.bf16 (!%p4816_p5), %v4834_v24, %v4833_v23 }
0x12fc   : > { %v3809_v34 = vsub.f32 %v3797_v26, %v3807_v32  ;;  %v5537_v32 = vpack.c.bf16 (!%p4816_p5), %v4839_v28, %v4838_v27 }
0x12fd   : > { %v3812_v19 = vmul.f32 %v3810_v33, %v3810_v33 }
0x12fe   : > { %v3811_v35 = vmul.f32 %v3809_v34, %v3809_v34 }
0x12ff   : > { %v3816_v36 = vsel %vm948_vm1, %v3812_v19, 0.0  ;;  %v4840_v19 = vld [vmem:[%s6430_s23 + $0xb0] sm:$0xff] (!%p4816_p5) }
0x1300   : > { %3817 = vadd.xlane.f32.xlu1 %v3816_v36  ;;  %v3813_v39 = vsel %vm948_vm1, %v3811_v35, 0.0  ;;  %v4841_v35 = vld [vmem:[%s6430_s23 + $0xb8] sm:$0xff] (!%p4816_p5) }
0x1301   : > { %3814 = vadd.xlane.f32.xlu0 %v3813_v39 }
0x138d   : > { %v3818_v17 = vpop.xlane.xlu1 %3817 }
0x138e   : > { %v3820_v14 = vmul.f32 0.03125, %v3818_v17  ;;  %v3815_v7 = vpop.xlane.xlu0 %3814 }
0x138f   : > { %v3819_v40 = vmul.f32 0.03125, %v3815_v7  ;;  %v4843_v7 = vld [vmem:[%s6430_s23 + $0xc0] sm:$0xff] (!%p4816_p5) }
0x1390   : > { %v3822_v41 = vadd.f32 1e-05, %v3820_v14  ;;  %v5540_v14 = vpack.c.bf16 (!%p4816_p5), %v4841_v35, %v4840_v19 }
0x1391   : > { %v3821_v42 = vadd.f32 1e-05, %v3819_v40  ;;  %v4844_v40 = vld [vmem:[%s6430_s23 + $0xc8] sm:$0xff] (!%p4816_p5) }
0x1392   : > { %5616 = vrsqrt.f32 %v3822_v41 }
0x1393   : > { %5618 = vrsqrt.f32 %v3821_v42 }
0x139c   : > { %v5617_v43 = vpop.eup %5616 }
0x139d   : > { %v5619_v45 = vpop.eup %5618  ;;  %v3826_v46 = vmul.f32 %v5617_v43, %v3810_v33  ;;  %v4835_v33 = vld [vmem:[%s6430_s23 + $0x90] sm:$0xff] (!%p4816_p5)  ;;  %v4848_v43 = vld [vmem:[%s6430_s23 + $0xe0] sm:$0xff] (!%p4816_p5) }
0x139e   : > { %v3825_v48 = vmul.f32 %v5619_v45, %v3809_v34  ;;  %3848 = sbr.rel (%p4816_p5) target bundleno = 5302 (0x14b6), region = 108  ;;  %v4836_v34 = vld [vmem:[%s6430_s23 + $0x98] sm:$0xff] (!%p4816_p5) }
0x139f   : > { %v3834_v49 = vmul.f32 %v4814_v44, %v3826_v46  ;;  %v5534_v36 = vpack.c.bf16 (!%p4816_p5), %v4836_v34, %v4835_v33  ;;  %v5543_v46 = vpack.c.bf16 (!%p4816_p5), %v4844_v40, %v4843_v7 }
0x13a0   : > { %v3833_v50 = vmul.f32 %v4814_v44, %v3825_v48  ;;  %v4849_v44 = vld [vmem:[%s6430_s23 + $0xe8] sm:$0xff] (!%p4816_p5) }
0x13a1   : > { %v6166_v51 = vadd.f32 %v4815_v47, %v3834_v49  ;;  %v5549_v48 = vpack.c.bf16 (!%p4816_p5), %v4849_v44, %v4848_v43  ;;  %v4845_v49 = vld [vmem:[%s6430_s23 + $0xd0] sm:$0xff] (!%p4816_p5) }
0x13a2   : > { %v6168_v52 = vadd.f32 %v4815_v47, %v3833_v50  ;;  %v4846_v50 = vld [vmem:[%s6430_s23 + $0xd8] sm:$0xff] (!%p4816_p5) }
0x13a3   : > { %3844 = vst.msk [vmem:[#allocation2 + $0x8] sm:$0xff] %vm948_vm1, %v6166_v51  ;;  %v3935_v2 = vrot.slane (!%p4816_p5), %v6166_v51, 7  ;;  %v4015_v21 = vrot.slane (!%p4816_p5), %v6166_v51, 1  ;;  %v4096_v26 = vrot.slane (!%p4816_p5), %v6166_v51, 2  ;;  %v4177_v17 = vrot.slane (!%p4816_p5), %v6166_v51, 3 }
0x13a4   : > { %3843 = vst.msk [vmem:[#allocation2] sm:$0xff] %vm948_vm1, %v6168_v52  ;;  %v3860_v38 = vrot.slane (!%p4816_p5), %v6168_v52, 1  ;;  %v4014_v20 = vrot.slane (!%p4816_p5), %v6168_v52, 2  ;;  %v4095_v25 = vrot.slane (!%p4816_p5), %v6168_v52, 3  ;;  %v4176_v39 = vrot.slane (!%p4816_p5), %v6168_v52, 4 }
0x13a5   : > { %v3936_v9 = vsel %vm3861_vm6, %v3935_v2, %v6168_v52  ;;  %v4257_v41 = vrot.slane %v6168_v52, 5  ;;  %v4258_v42 = vrot.slane %v6166_v51, 4  ;;  %v5546_v55 = vpack.c.bf16 %v4846_v50, %v4845_v49 }
0x13a6   : > { %v3862_v6 = vsel %vm3861_vm6, %v6166_v51, %v3860_v38  ;;  %5318 = vmatmul.mubr.msk.f32.vlgmr.msra.gmra.mrb[0].mxu1 %vm948_vm1, %v3936_v9  ;;  %v4016_v29 = vsel %vm3861_vm6, %v4015_v21, %v4014_v20  ;;  %v4097_v31 = vsel %vm3861_vm6, %v4096_v26, %v4095_v25  ;;  %v4178_v45 = vsel %vm3861_vm6, %v4177_v17, %v4176_v39  ;;  %v4853_v20 = vld [vmem:[%s6431_s5] ss:$0 sm:$0xff] }
0x13a7   : > { %5307 = vmatmul.mubr.msk.f32.vlgmr.msra.gmra.mrb[0].mxu0 %vm948_vm1, %v3862_v6  ;;  %5526 = vmatpush3.bf16.msra.mxu1 %v5525_v10  ;;  %v4259_v47 = vsel %vm3861_vm6, %v4258_v42, %v4257_v41  ;;  %v4338_v57 = vrot.slane %v6168_v52, 6  ;;  %v4339_v58 = vrot.slane %v6166_v51, 5  ;;  %v4419_v60 = vrot.slane %v6168_v52, 7 }
0x13a8   : > { %5520 = vmatpush3.bf16.msra.mxu0 %v5519_v8  ;;  %5527 = vmatprep.subr.bf16.mxu1 %v5664_v56  ;;  %v4420_v61 = vrot.slane %v6166_v51, 6 }
0x13a9   : > { %5521 = vmatprep.subr.bf16.mxu0 %v5664_v56  ;;  %5328 = vmatprep.mubr.msk.f32.mxu0 %vm5665_vm5, %v5666_v16  ;;  %v4340_v62 = vsel %vm3861_vm6, %v4339_v58, %v4338_v57 }
0x13aa   : > { %5339 = vmatprep.mubr.msk.f32.mxu1 %vm5665_vm5, %v5666_v16  ;;  %v4421_v63 = vsel %vm3861_vm6, %v4420_v61, %v4419_v60 }
0x13ab   : > { %5529 = vmatpush3.bf16.msra.mxu1 %v5528_v22 }
0x13ac   : > { %5523 = vmatpush3.bf16.msra.mxu0 %v5522_v18  ;;  %5536 = vmatprep.subr.bf16.mxu1 %v5664_v56 }
0x13ad   : > { %5530 = vmatprep.subr.bf16.mxu0 %v5664_v56 }
0x13ae   : > { %5340 = vmatmul.mubr.msk.f32.vlgmr.msra.gmra.mrb[2].mxu1 %vm948_vm1, %v4097_v31 }
0x13af   : > { %5329 = vmatmul.mubr.msk.f32.vlgmr.msra.gmra.mrb[2].mxu0 %vm948_vm1, %v4016_v29  ;;  %5538 = vmatpush3.bf16.msra.mxu1 %v5537_v32 }
0x13b0   : > { %5532 = vmatpush3.bf16.msra.mxu0 %v5531_v30  ;;  %5539 = vmatprep.subr.bf16.mxu1 %v5664_v56 }
0x13b1   : > { %5533 = vmatprep.subr.bf16.mxu0 %v5664_v56  ;;  %5350 = vmatprep.mubr.msk.f32.mxu0 %vm5665_vm5, %v5666_v16 }
0x13b2   : > { %5361 = vmatprep.mubr.msk.f32.mxu1 %vm5665_vm5, %v5666_v16 }
0x13b3   : > { %5541 = vmatpush3.bf16.msra.mxu1 %v5540_v14 }
0x13b4   : > { %5535 = vmatpush3.bf16.msra.mxu0 %v5534_v36  ;;  %5548 = vmatprep.subr.bf16.mxu1 %v5664_v56 }
0x13b5   : > { %5542 = vmatprep.subr.bf16.mxu0 %v5664_v56 }
0x13b6   : > { %5362 = vmatmul.mubr.msk.f32.vlgmr.msra.gmra.mrb[4].mxu1 %vm948_vm1, %v4259_v47 }
0x13b7   : > { %5351 = vmatmul.mubr.msk.f32.vlgmr.msra.gmra.mrb[4].mxu0 %vm948_vm1, %v4178_v45  ;;  %5550 = vmatpush3.bf16.msra.mxu1 %v5549_v48 }
0x13b8   : > { %5544 = vmatpush3.bf16.msra.mxu0 %v5543_v46  ;;  %5551 = vmatprep.subr.bf16.mxu1 %v5664_v56 }
0x13b9   : > { %5545 = vmatprep.subr.bf16.mxu0 %v5664_v56  ;;  %5372 = vmatprep.mubr.msk.f32.mxu0 %vm5665_vm5, %v5666_v16 }
0x13ba   : > { %5383 = vmatprep.mubr.msk.f32.mxu1 %vm5665_vm5, %v5666_v16 }
0x13bb   : > { %5553 = vmatpush3.bf16.msra.mxu1 %v5552_v59 }
0x13bc   : > { %5547 = vmatpush3.bf16.msra.mxu0 %v5546_v55 }
0x13be   : > { %5384 = vmatmul.mubr.msk.f32.vlgmr.msra.gmra.mrb[6].mxu1 %vm948_vm1, %v4421_v63 }
0x13bf   : > { %5373 = vmatmul.mubr.msk.f32.vlgmr.msra.gmra.mrb[6].mxu0 %vm948_vm1, %v4340_v62 }
0x1479   : > { %v4005_v0 = vpop.f32.mrb[0].mxu1 }
0x147a   : > { %v3931_v52 = vpop.f32.mrb[0].mxu0  ;;  %v5319_v38 = vpop.f32.mrb[1].mxu1 }
0x147b   : > { %v5308_v51 = vpop.f32.mrb[1].mxu0  ;;  %v4006_v56 = vadd.f32 %v4005_v0, %v3931_v52 }
0x1481   : > { %v4166_v3 = vpop.f32.mrb[2].mxu1 }
0x1482   : > { %v4085_v1 = vpop.f32.mrb[2].mxu0  ;;  %v5341_v16 = vpop.f32.mrb[3].mxu1 }
0x1483   : > { %v4089_v2 = vadd.f32 %v4085_v1, %v4006_v56  ;;  %v5330_v37 = vpop.f32.mrb[3].mxu0 }
0x1485   : > { %v4170_v4 = vadd.f32 %v4166_v3, %v4089_v2 }
0x1489   : > { %v4328_v9 = vpop.f32.mrb[4].mxu1 }
0x148a   : > { %v4247_v5 = vpop.f32.mrb[4].mxu0  ;;  %v5363_v10 = vpop.f32.mrb[5].mxu1 }
0x148b   : > { %v4251_v6 = vadd.f32 %v4247_v5, %v4170_v4  ;;  %v5352_v8 = vpop.f32.mrb[5].mxu0 }
0x148d   : > { %v4332_v11 = vadd.f32 %v4328_v9, %v4251_v6 }
0x1491   : > { %v4490_v18 = vpop.f32.mrb[6].mxu1 }
0x1492   : > { %v4409_v12 = vpop.f32.mrb[6].mxu0  ;;  %v5385_v21 = vpop.f32.mrb[7].mxu1 }
0x1493   : > { %v4413_v13 = vadd.f32 %v4409_v12, %v4332_v11  ;;  %v5374_v15 = vpop.f32.mrb[7].mxu0 }
0x1495   : > { %v4494_v22 = vadd.f32 %v4490_v18, %v4413_v13 }
0x1497   : > { %v4502_v23 = vadd.f32 %v4853_v20, %v4494_v22 }
0x1499   : > { %v4503_v24 = vsub.f32 0.0, %v4502_v23 }
0x149b   : > { %v4504_v25 = vmul.f32 1.442695, %v4503_v24 }
0x149d   : > { %5620 = vpow2.f32 %v4504_v25 }
0x14a7   : > { %v5621_v26 = vpop.eup %5620 }
0x14a8   : > { %v4506_v27 = vadd.f32 1.0, %v5621_v26 }
0x14aa   : > { %5622 = vrcp.f32 %v4506_v27 }
0x14b4   : > { %v5623_v28 = vpop.eup %5622 }
0x14b5   : > { %4509 = vst.msk [vmem:[#allocation3] sm:$0x3] %vm4508_vm7, %v5623_v28 }
0x14b6 PF: > { %s6432_s1 = sld [smem:[#allocation7_spill]]  ;;  %s5667_s19 = smov [#allocation3]  }
0x14b7   : > { %s4517_s3 = sshll.u32 %s5667_s19, 4  ;;  %s4518_s3 = int_to_ptr.vmem [resolvable:$true] %s4517_s3 }
0x14b8   : > { %s5624_s4 = scalar_lea.vmem %s4518_s3, 32  ;;  %p5631_p10 = scmp.lt.s32.totalorder %s4518_s3, %s4518_s3 }
0x14b9   : > { %p5625_p7 = scmp.ne.s32.totalorder %s4518_s3, %s5624_s4  ;;  %p5632_p11 = scmp.lt.s32.totalorder %s5624_s4, %s5624_s4 }
0x14bb   : > { %p5633_p12 = por %p5632_p11, %p5631_p10 }
0x14bc   : > { %p5564_p6 = scmp.eq.s32.totalorder %s6432_s1, 1 }
0x14be   : > { %p5626_p8 = pnand %p5625_p7, %p5564_p6 }
0x14c0   : > { %p5627_p9 = pneg %p5626_p8 }
0x14c2   : > { %p5634_p13 = pnand %p5633_p12, %p5627_p9 }
0x14c4   : > { %5637 = shalt.err (!%p5634_p13)
}
0x14c5   : > { %s6433_s0 = sld [smem:[#allocation22_spill]] }
0x14cb   : > { %s5638_s22 = scalar_lea.hbm %s6433_s0, 32 }
0x14cc   : > { %p5639_p0 = scmp.ne.s32.totalorder %s6433_s0, %s5638_s22  ;;  %p5644_p3 = scmp.lt.u32.totalorder %s5638_s22, %s6433_s0 }
0x14ce   : > { %p5640_p1 = pnand %p5639_p0, %p5564_p6 }
0x14d0   : > { %p5641_p2 = pneg %p5640_p1 }
0x14d2   : > { %p5646_p4 = pnand %p5644_p3, %p5641_p2 }
0x14d4   : > { %5649 = shalt.err (!%p5646_p4)
}
0x14d5   : > { %5561 = dma.vmem_to_hbm [thread:$0]  (%p5564_p6), %s4518_s3, 32, %s6433_s0, [#allocation4]  }
0x14d6   : > { %5655 = dma.done.wait (%p5564_p6), [#allocation4], 32  }
0x14d7   : > { %5657 = vsyncadd (%p5564_p6), [#allocation4], 4294967264 }
0x14d8 PF: > { %s6434_s21 = sld [smem:[#allocation6_spill]] }
0x14de   : > { %s31_s1 = sadd.s32 1, %s6434_s21  }
0x14df   : > { %p28_p5 = scmp.ge.s32.totalorder %s31_s1, 4  }
0x14e1   :  { %30 = sbr.rel (!%p28_p5) target bundleno = 14 (0xe), region = 187 }
0x14e8   :  { %4530 = vsyncpa [#allocation4], 1 }
0x14e9   :  { %4532 = vsyncpa [#allocation4 + $0x1], 1 }

</bundles_post_ra>
